<compile_context>
chip_gen: v7x
topology: tpu7x:2x2x1
jax: 0.10.0
libtpu: 0.0.40
codegen_flags: <defaults>
</compile_context>

<pallas_src>
import math

import jax
import jax.numpy as jnp
from jax.experimental import pallas as pl
from jax.experimental.pallas import tpu as pltpu

EXTEND_BASE_SIZE = 4      # input "bases" channels (one-hot DNA)

# ----- hyper-params (mirror of the PyTorch params dataclass) -----
CONV1_OUT_CHANNELS = 10
CONV1_KERNEL_SIZE = 10
CONV1_STRIDE = 1
LATENT_DIMS = 2
SEQ_SIZE = 32
BATCH = 2

HIDDEN1 = 512
HIDDEN2 = 256


def calculate_output_size_conv1d(seq_size, kernel_size, stride):
    return math.floor((seq_size - (kernel_size - 1) - 1) / stride + 1)


CONV1_OUT_SIZE = calculate_output_size_conv1d(SEQ_SIZE, CONV1_KERNEL_SIZE, CONV1_STRIDE)  # 23

KC1 = CONV1_KERNEL_SIZE * EXTEND_BASE_SIZE + 1                # 41: im2col rows (+1 for bias fold)
CH_SLOT = ((CONV1_OUT_SIZE + 31) // 32) * 32                  # 32: lane slot per conv channel
FLAT_PAD = CONV1_OUT_CHANNELS * CH_SLOT                       # 320: padded flatten width

# misc buffer row layout (lane width = HIDDEN1 = 512)
ROW_B1 = CONV1_OUT_CHANNELS                                   # row 10: linear1 bias
ROW_B2 = ROW_B1 + 1                                           # row 11: linear2 bias (lanes 0:256)
ROW_B34 = ROW_B2 + 1                                          # row 12: [l3_b, l4_b] (lanes 0:2*LD)
MISC_ROWS = 16


# ---------------- Fused encoder kernel ----------------
def _encoder_kernel(x_ref, misc_ref, w1_ref, w2_ref, w34_ref, out_ref):
    f32 = jnp.float32
    B, C, S = BATCH, EXTEND_BASE_SIZE, SEQ_SIZE
    CO, K, L, LD = CONV1_OUT_CHANNELS, CONV1_KERNEL_SIZE, CONV1_OUT_SIZE, LATENT_DIMS

    misc = misc_ref[...]                                  # (16, 512) f32, packed small operands
    wc = misc[0:CO, 0:KC1]                                # (CO, K*C+1): conv weight + bias column
    b1 = misc[ROW_B1:ROW_B1 + 1, :]                       # (1, 512)
    b2 = misc[ROW_B2:ROW_B2 + 1, 0:HIDDEN2]               # (1, 256)
    b34 = misc[ROW_B34:ROW_B34 + 1, 0:2 * LD]             # (1, 2*LD)

    # ---- Conv1d(C -> CO, K, stride 1) + bias + ReLU : one MXU matmul per batch ----
    # x rows are torch's x.reshape(batch, bases, seq) rows (pure row-major reinterpretation).
    # TODO(synk): im2col below assumes CONV1_STRIDE == 1 (the module default).
    x = x_ref[...]                                        # (B*C, S) f32
    pad_cols = (K - 1 + CH_SLOT) - S                      # keep all k-slices in-bounds
    xp = jnp.concatenate([x, jnp.zeros((B * C, pad_cols), f32)], axis=1)

    ones_row = jnp.ones((1, CH_SLOT), f32)                # folds the conv bias into the matmul
    conv = []
    for b in range(B):                                    # B = 2, fully unrolled
        xb = xp[b * C:(b + 1) * C, :]                     # (C, S+pad)
        im2col = jnp.concatenate(
            [xb[:, k:k + CH_SLOT] for k in range(K)] + [ones_row], axis=0)    # (K*C+1, CH_SLOT)
        cb = jnp.dot(wc, im2col, preferred_element_type=f32)                  # (CO, CH_SLOT)
        conv.append(jnp.maximum(cb, 0.0))                 # ReLU
    # Lanes l >= L of each channel slot hold finite junk; the matching w1 rows are zero,
    # so they contribute nothing to linear1 (this replaces any explicit zero-fill).

    # ---- torch.flatten(start_dim=1), rebuilt in registers with CH_SLOT-aligned slots ----
    h0 = jnp.concatenate(
        [jnp.concatenate([cb[co:co + 1, :] for cb in conv], axis=0)           # (B, CH_SLOT)
         for co in range(CO)], axis=1)                                        # (B, CO*CH_SLOT)

    # ---- linear1 + ReLU, linear2 + ReLU, fused linear3|linear4 ----
    h1 = jnp.dot(h0.astype(w1_ref.dtype), w1_ref[...], preferred_element_type=f32) + b1
    h1 = jnp.maximum(h1, 0.0)                                                 # (B, 512)
    h2 = jnp.dot(h1.astype(w2_ref.dtype), w2_ref[...], preferred_element_type=f32) + b2
    h2 = jnp.maximum(h2, 0.0)                                                 # (B, 256)
    out_ref[...] = jnp.dot(h2, w34_ref[...], preferred_element_type=f32) + b34   # (B, 2*LD)


# ---------------- Parameter init (PyTorch-default-style uniform) ----------------
def _uinit(key, shape, fan_in):
    bound = 1.0 / math.sqrt(fan_in)
    return jax.random.uniform(key, shape, jnp.float32, -bound, bound)


def init_torch_params(key):
    """Parameters in native PyTorch layout (Conv1d: (C_out, C_in, K); Linear: (out, in))."""
    C, K, CO, L, LD = (EXTEND_BASE_SIZE, CONV1_KERNEL_SIZE, CONV1_OUT_CHANNELS,
                       CONV1_OUT_SIZE, LATENT_DIMS)
    ks = jax.random.split(key, 10)
    return {
        "conv_w": _uinit(ks[0], (CO, C, K), C * K),
        "conv_b": _uinit(ks[1], (CO,), C * K),
        "l1_w": _uinit(ks[2], (HIDDEN1, L * CO), L * CO),
        "l1_b": _uinit(ks[3], (HIDDEN1,), L * CO),
        "l2_w": _uinit(ks[4], (HIDDEN2, HIDDEN1), HIDDEN1),
        "l2_b": _uinit(ks[5], (HIDDEN2,), HIDDEN1),
        "l3_w": _uinit(ks[6], (LD, HIDDEN2), HIDDEN2),
        "l3_b": _uinit(ks[7], (LD,), HIDDEN2),
        "l4_w": _uinit(ks[8], (LD, HIDDEN2), HIDDEN2),
        "l4_b": _uinit(ks[9], (LD,), HIDDEN2),
    }


def pack_params(p, weights_dtype=jnp.float32):
    """One-time host-side repack into MXU-ready layouts.

    weights_dtype=jnp.bfloat16 halves the dominant w1/w2 HBM->VMEM DMA (recommended on
    v6e/v7x); biases, the tiny conv/latent weights and all accumulation remain f32.
    """
    C, K, CO, L, LD = (EXTEND_BASE_SIZE, CONV1_KERNEL_SIZE, CONV1_OUT_CHANNELS,
                       CONV1_OUT_SIZE, LATENT_DIMS)

    # Conv weight (CO, C, K) -> (CO, K*C) with column k*C + c, plus the bias as column K*C.
    wc = jnp.transpose(p["conv_w"], (0, 2, 1)).reshape(CO, K * C)
    wc_aug = jnp.concatenate([wc, p["conv_b"].reshape(CO, 1)], axis=1)        # (CO, K*C+1)

    # Packed small operands: one DMA instead of five.
    misc = jnp.zeros((MISC_ROWS, HIDDEN1), jnp.float32)
    misc = misc.at[0:CO, 0:KC1].set(wc_aug)
    misc = misc.at[ROW_B1, :].set(p["l1_b"])
    misc = misc.at[ROW_B2, 0:HIDDEN2].set(p["l2_b"])
    misc = misc.at[ROW_B34, 0:2 * LD].set(jnp.concatenate([p["l3_b"], p["l4_b"]]))

    # linear1 weight (512, CO*L) -> (CO*CH_SLOT, 512): channel-slot rows, zero rows for l >= L.
    w1t = p["l1_w"].T.reshape(CO, L, HIDDEN1)             # w1t[co, l, o] = l1_w[o, co*L + l]
    w1p = jnp.zeros((CO, CH_SLOT, HIDDEN1), jnp.float32).at[:, :L, :].set(w1t)
    w1p = w1p.reshape(CO * CH_SLOT, HIDDEN1).astype(weights_dtype)            # (320, 512)

    w2 = p["l2_w"].T.astype(weights_dtype)                                    # (512, 256)
    w34 = jnp.concatenate([p["l3_w"].T, p["l4_w"].T], axis=1)                 # (256, 2*LD) f32
    return {"misc": misc, "w1": w1p, "w2": w2, "w34": w34}


# ---------------- Forward pass ----------------
def encoder_forward(x, packed):
    B, S, C = x.shape
    assert (B, S, C) == (BATCH, SEQ_SIZE, EXTEND_BASE_SIZE)
    assert CONV1_STRIDE == 1
    # torch: x.reshape(batch, bases, seq) is a pure row-major reinterpretation; flatten it
    # to (B*bases, seq) for the kernel (same memory order, no transpose).
    xr = x.reshape(B * C, S).astype(jnp.float32)

    flops = 2 * BATCH * (CONV1_OUT_CHANNELS * KC1 * CH_SLOT
                         + FLAT_PAD * HIDDEN1
                         + HIDDEN1 * HIDDEN2
                         + HIDDEN2 * 2 * LATENT_DIMS)
    bytes_accessed = (xr.size * 4
                      + sum(packed[k].size * packed[k].dtype.itemsize
                            for k in ("misc", "w1", "w2", "w34"))
                      + BATCH * 2 * LATENT_DIMS * 4)

    vmem = pl.BlockSpec(memory_space=pltpu.MemorySpace.VMEM)
    out = pl.pallas_call(
        _encoder_kernel,
        out_shape=jax.ShapeDtypeStruct((B, 2 * LATENT_DIMS), jnp.float32),
        in_specs=[vmem] * 5,
        out_specs=vmem,
        cost_estimate=pl.CostEstimate(flops=flops, transcendentals=0,
                                      bytes_accessed=bytes_accessed),
    )(xr, packed["misc"], packed["w1"], packed["w2"], packed["w34"])
    return out[:, :LATENT_DIMS], out[:, LATENT_DIMS:]


# ---------------- Pure-JAX reference (mirrors the PyTorch forward) ----------------
def _reference_forward(p, x):
    B, S, C = x.shape
    K, L = CONV1_KERNEL_SIZE, CONV1_OUT_SIZE
    xr = x.reshape(B, C, S)                                               # reinterpretation
    cols = jnp.stack([xr[:, :, l:l + K] for l in range(L)], axis=2)       # (B, C, L, K)
    conv = jnp.einsum("bclk,ock->bol", cols, p["conv_w"]) + p["conv_b"][None, :, None]
    h = jnp.maximum(conv, 0.0).reshape(B, -1)                             # flatten(start_dim=1)
    h = jnp.maximum(h @ p["l1_w"].T + p["l1_b"], 0.0)
    h = jnp.maximum(h @ p["l2_w"].T + p["l2_b"], 0.0)
    mu = h @ p["l3_w"].T + p["l3_b"]
    log_var = h @ p["l4_w"].T + p["l4_b"]
    return mu, log_var


if __name__ == "__main__":
    key = jax.random.PRNGKey(0)
    k_params, k_x = jax.random.split(key)

    params = init_torch_params(k_params)
    x = jax.random.uniform(k_x, (BATCH, SEQ_SIZE, EXTEND_BASE_SIZE), jnp.float32)

    fwd = jax.jit(encoder_forward)

    # --- exact-semantics path: f32 weights ---
    packed = pack_params(params)                          # host-side repack, done once
    mu, log_var = fwd(x, packed)
    jax.block_until_ready((mu, log_var))

    mu_ref, lv_ref = _reference_forward(params, x)
    assert mu.shape == (BATCH, LATENT_DIMS) and log_var.shape == (BATCH, LATENT_DIMS)
    assert bool(jnp.allclose(mu, mu_ref, atol=2e-4, rtol=2e-4))
    assert bool(jnp.allclose(log_var, lv_ref, atol=2e-4, rtol=2e-4))

    # --- reduced-DMA path: bf16 big weights (v6e/v7x recommendation), f32 accumulate ---
    packed_bf16 = pack_params(params, weights_dtype=jnp.bfloat16)
    mu_b, lv_b = fwd(x, packed_bf16)
    jax.block_until_ready((mu_b, lv_b))
    assert bool(jnp.all(jnp.isfinite(mu_b))) and bool(jnp.all(jnp.isfinite(lv_b)))

    print("KERNEL_OK")
</pallas_src>

<mosaic_0001>
module attributes {stable_mosaic.version = 11 : i64} {
  func.func @_encoder_kernel(%arg0: memref<8x32xf32, #tpu.memory_space<vmem>>, %arg1: memref<16x512xf32, #tpu.memory_space<vmem>>, %arg2: memref<320x512xf32, #tpu.memory_space<vmem>>, %arg3: memref<512x256xf32, #tpu.memory_space<vmem>>, %arg4: memref<256x4xf32, #tpu.memory_space<vmem>>, %arg5: memref<2x4xf32, #tpu.memory_space<vmem>>) attributes {dimension_semantics = [], scalar_prefetch = 0 : i64, scratch_operands = 0 : i64, tpu.core_type = #tpu.core_type<tc>} {
    %c0 = arith.constant 0 : index
    %c0_0 = arith.constant 0 : index
    %0 = vector.load %arg1[%c0, %c0_0] : memref<16x512xf32, #tpu.memory_space<vmem>>, vector<16x512xf32>
    %1 = vector.extract_strided_slice %0 {offsets = [0, 0], sizes = [10, 41], strides = [1, 1]} : vector<16x512xf32> to vector<10x41xf32>
    %2 = vector.extract_strided_slice %0 {offsets = [10, 0], sizes = [1, 512], strides = [1, 1]} : vector<16x512xf32> to vector<1x512xf32>
    %3 = vector.extract_strided_slice %0 {offsets = [11, 0], sizes = [1, 256], strides = [1, 1]} : vector<16x512xf32> to vector<1x256xf32>
    %4 = vector.extract_strided_slice %0 {offsets = [12, 0], sizes = [1, 4], strides = [1, 1]} : vector<16x512xf32> to vector<1x4xf32>
    %c0_1 = arith.constant 0 : index
    %c0_2 = arith.constant 0 : index
    %5 = vector.load %arg0[%c0_1, %c0_2] : memref<8x32xf32, #tpu.memory_space<vmem>>, vector<8x32xf32>
    %cst = arith.constant 0.000000e+00 : f32
    %6 = vector.broadcast %cst : f32 to vector<8x9xf32>
    %7 = tpu.concatenate %5, %6 in 1 : vector<8x32xf32>, vector<8x9xf32> -> vector<8x41xf32>
    %cst_3 = arith.constant 1.000000e+00 : f32
    %8 = vector.broadcast %cst_3 : f32 to vector<1x32xf32>
    %9 = vector.extract_strided_slice %7 {offsets = [0, 0], sizes = [4, 41], strides = [1, 1]} : vector<8x41xf32> to vector<4x41xf32>
    %10 = vector.extract_strided_slice %9 {offsets = [0, 0], sizes = [4, 32], strides = [1, 1]} : vector<4x41xf32> to vector<4x32xf32>
    %11 = vector.extract_strided_slice %9 {offsets = [0, 1], sizes = [4, 32], strides = [1, 1]} : vector<4x41xf32> to vector<4x32xf32>
    %12 = vector.extract_strided_slice %9 {offsets = [0, 2], sizes = [4, 32], strides = [1, 1]} : vector<4x41xf32> to vector<4x32xf32>
    %13 = vector.extract_strided_slice %9 {offsets = [0, 3], sizes = [4, 32], strides = [1, 1]} : vector<4x41xf32> to vector<4x32xf32>
    %14 = vector.extract_strided_slice %9 {offsets = [0, 4], sizes = [4, 32], strides = [1, 1]} : vector<4x41xf32> to vector<4x32xf32>
    %15 = vector.extract_strided_slice %9 {offsets = [0, 5], sizes = [4, 32], strides = [1, 1]} : vector<4x41xf32> to vector<4x32xf32>
    %16 = vector.extract_strided_slice %9 {offsets = [0, 6], sizes = [4, 32], strides = [1, 1]} : vector<4x41xf32> to vector<4x32xf32>
    %17 = vector.extract_strided_slice %9 {offsets = [0, 7], sizes = [4, 32], strides = [1, 1]} : vector<4x41xf32> to vector<4x32xf32>
    %18 = vector.extract_strided_slice %9 {offsets = [0, 8], sizes = [4, 32], strides = [1, 1]} : vector<4x41xf32> to vector<4x32xf32>
    %19 = vector.extract_strided_slice %9 {offsets = [0, 9], sizes = [4, 32], strides = [1, 1]} : vector<4x41xf32> to vector<4x32xf32>
    %20 = tpu.concatenate %10, %11, %12, %13, %14, %15, %16, %17, %18, %19, %8 in 0 : vector<4x32xf32>, vector<4x32xf32>, vector<4x32xf32>, vector<4x32xf32>, vector<4x32xf32>, vector<4x32xf32>, vector<4x32xf32>, vector<4x32xf32>, vector<4x32xf32>, vector<4x32xf32>, vector<1x32xf32> -> vector<41x32xf32>
    %cst_4 = arith.constant dense<0.000000e+00> : vector<10x32xf32>
    %21 = tpu.matmul %1, %20, %cst_4 {dimension_numbers = #tpu.dot_dimension_numbers<[1], [0], [0], [1], [0, 0, 1, 1], [], []>} : vector<10x41xf32>, vector<41x32xf32>, vector<10x32xf32> -> vector<10x32xf32>
    %cst_5 = arith.constant 0.000000e+00 : f32
    %22 = vector.broadcast %cst_5 : f32 to vector<10x32xf32>
    %23 = arith.maximumf %21, %22 : vector<10x32xf32>
    %24 = vector.extract_strided_slice %7 {offsets = [4, 0], sizes = [4, 41], strides = [1, 1]} : vector<8x41xf32> to vector<4x41xf32>
    %25 = vector.extract_strided_slice %24 {offsets = [0, 0], sizes = [4, 32], strides = [1, 1]} : vector<4x41xf32> to vector<4x32xf32>
    %26 = vector.extract_strided_slice %24 {offsets = [0, 1], sizes = [4, 32], strides = [1, 1]} : vector<4x41xf32> to vector<4x32xf32>
    %27 = vector.extract_strided_slice %24 {offsets = [0, 2], sizes = [4, 32], strides = [1, 1]} : vector<4x41xf32> to vector<4x32xf32>
    %28 = vector.extract_strided_slice %24 {offsets = [0, 3], sizes = [4, 32], strides = [1, 1]} : vector<4x41xf32> to vector<4x32xf32>
    %29 = vector.extract_strided_slice %24 {offsets = [0, 4], sizes = [4, 32], strides = [1, 1]} : vector<4x41xf32> to vector<4x32xf32>
    %30 = vector.extract_strided_slice %24 {offsets = [0, 5], sizes = [4, 32], strides = [1, 1]} : vector<4x41xf32> to vector<4x32xf32>
    %31 = vector.extract_strided_slice %24 {offsets = [0, 6], sizes = [4, 32], strides = [1, 1]} : vector<4x41xf32> to vector<4x32xf32>
    %32 = vector.extract_strided_slice %24 {offsets = [0, 7], sizes = [4, 32], strides = [1, 1]} : vector<4x41xf32> to vector<4x32xf32>
    %33 = vector.extract_strided_slice %24 {offsets = [0, 8], sizes = [4, 32], strides = [1, 1]} : vector<4x41xf32> to vector<4x32xf32>
    %34 = vector.extract_strided_slice %24 {offsets = [0, 9], sizes = [4, 32], strides = [1, 1]} : vector<4x41xf32> to vector<4x32xf32>
    %35 = tpu.concatenate %25, %26, %27, %28, %29, %30, %31, %32, %33, %34, %8 in 0 : vector<4x32xf32>, vector<4x32xf32>, vector<4x32xf32>, vector<4x32xf32>, vector<4x32xf32>, vector<4x32xf32>, vector<4x32xf32>, vector<4x32xf32>, vector<4x32xf32>, vector<4x32xf32>, vector<1x32xf32> -> vector<41x32xf32>
    %cst_6 = arith.constant dense<0.000000e+00> : vector<10x32xf32>
    %36 = tpu.matmul %1, %35, %cst_6 {dimension_numbers = #tpu.dot_dimension_numbers<[1], [0], [0], [1], [0, 0, 1, 1], [], []>} : vector<10x41xf32>, vector<41x32xf32>, vector<10x32xf32> -> vector<10x32xf32>
    %cst_7 = arith.constant 0.000000e+00 : f32
    %37 = vector.broadcast %cst_7 : f32 to vector<10x32xf32>
    %38 = arith.maximumf %36, %37 : vector<10x32xf32>
    %39 = vector.extract_strided_slice %23 {offsets = [0, 0], sizes = [1, 32], strides = [1, 1]} : vector<10x32xf32> to vector<1x32xf32>
    %40 = vector.extract_strided_slice %38 {offsets = [0, 0], sizes = [1, 32], strides = [1, 1]} : vector<10x32xf32> to vector<1x32xf32>
    %41 = tpu.concatenate %39, %40 in 0 : vector<1x32xf32>, vector<1x32xf32> -> vector<2x32xf32>
    %42 = vector.extract_strided_slice %23 {offsets = [1, 0], sizes = [1, 32], strides = [1, 1]} : vector<10x32xf32> to vector<1x32xf32>
    %43 = vector.extract_strided_slice %38 {offsets = [1, 0], sizes = [1, 32], strides = [1, 1]} : vector<10x32xf32> to vector<1x32xf32>
    %44 = tpu.concatenate %42, %43 in 0 : vector<1x32xf32>, vector<1x32xf32> -> vector<2x32xf32>
    %45 = vector.extract_strided_slice %23 {offsets = [2, 0], sizes = [1, 32], strides = [1, 1]} : vector<10x32xf32> to vector<1x32xf32>
    %46 = vector.extract_strided_slice %38 {offsets = [2, 0], sizes = [1, 32], strides = [1, 1]} : vector<10x32xf32> to vector<1x32xf32>
    %47 = tpu.concatenate %45, %46 in 0 : vector<1x32xf32>, vector<1x32xf32> -> vector<2x32xf32>
    %48 = vector.extract_strided_slice %23 {offsets = [3, 0], sizes = [1, 32], strides = [1, 1]} : vector<10x32xf32> to vector<1x32xf32>
    %49 = vector.extract_strided_slice %38 {offsets = [3, 0], sizes = [1, 32], strides = [1, 1]} : vector<10x32xf32> to vector<1x32xf32>
    %50 = tpu.concatenate %48, %49 in 0 : vector<1x32xf32>, vector<1x32xf32> -> vector<2x32xf32>
    %51 = vector.extract_strided_slice %23 {offsets = [4, 0], sizes = [1, 32], strides = [1, 1]} : vector<10x32xf32> to vector<1x32xf32>
    %52 = vector.extract_strided_slice %38 {offsets = [4, 0], sizes = [1, 32], strides = [1, 1]} : vector<10x32xf32> to vector<1x32xf32>
    %53 = tpu.concatenate %51, %52 in 0 : vector<1x32xf32>, vector<1x32xf32> -> vector<2x32xf32>
    %54 = vector.extract_strided_slice %23 {offsets = [5, 0], sizes = [1, 32], strides = [1, 1]} : vector<10x32xf32> to vector<1x32xf32>
    %55 = vector.extract_strided_slice %38 {offsets = [5, 0], sizes = [1, 32], strides = [1, 1]} : vector<10x32xf32> to vector<1x32xf32>
    %56 = tpu.concatenate %54, %55 in 0 : vector<1x32xf32>, vector<1x32xf32> -> vector<2x32xf32>
    %57 = vector.extract_strided_slice %23 {offsets = [6, 0], sizes = [1, 32], strides = [1, 1]} : vector<10x32xf32> to vector<1x32xf32>
    %58 = vector.extract_strided_slice %38 {offsets = [6, 0], sizes = [1, 32], strides = [1, 1]} : vector<10x32xf32> to vector<1x32xf32>
    %59 = tpu.concatenate %57, %58 in 0 : vector<1x32xf32>, vector<1x32xf32> -> vector<2x32xf32>
    %60 = vector.extract_strided_slice %23 {offsets = [7, 0], sizes = [1, 32], strides = [1, 1]} : vector<10x32xf32> to vector<1x32xf32>
    %61 = vector.extract_strided_slice %38 {offsets = [7, 0], sizes = [1, 32], strides = [1, 1]} : vector<10x32xf32> to vector<1x32xf32>
    %62 = tpu.concatenate %60, %61 in 0 : vector<1x32xf32>, vector<1x32xf32> -> vector<2x32xf32>
    %63 = vector.extract_strided_slice %23 {offsets = [8, 0], sizes = [1, 32], strides = [1, 1]} : vector<10x32xf32> to vector<1x32xf32>
    %64 = vector.extract_strided_slice %38 {offsets = [8, 0], sizes = [1, 32], strides = [1, 1]} : vector<10x32xf32> to vector<1x32xf32>
    %65 = tpu.concatenate %63, %64 in 0 : vector<1x32xf32>, vector<1x32xf32> -> vector<2x32xf32>
    %66 = vector.extract_strided_slice %23 {offsets = [9, 0], sizes = [1, 32], strides = [1, 1]} : vector<10x32xf32> to vector<1x32xf32>
    %67 = vector.extract_strided_slice %38 {offsets = [9, 0], sizes = [1, 32], strides = [1, 1]} : vector<10x32xf32> to vector<1x32xf32>
    %68 = tpu.concatenate %66, %67 in 0 : vector<1x32xf32>, vector<1x32xf32> -> vector<2x32xf32>
    %69 = tpu.concatenate %41, %44, %47, %50, %53, %56, %59, %62, %65, %68 in 1 : vector<2x32xf32>, vector<2x32xf32>, vector<2x32xf32>, vector<2x32xf32>, vector<2x32xf32>, vector<2x32xf32>, vector<2x32xf32>, vector<2x32xf32>, vector<2x32xf32>, vector<2x32xf32> -> vector<2x320xf32>
    %c0_8 = arith.constant 0 : index
    %c0_9 = arith.constant 0 : index
    %70 = vector.load %arg2[%c0_8, %c0_9] : memref<320x512xf32, #tpu.memory_space<vmem>>, vector<320x512xf32>
    %cst_10 = arith.constant dense<0.000000e+00> : vector<2x512xf32>
    %71 = tpu.matmul %69, %70, %cst_10 {dimension_numbers = #tpu.dot_dimension_numbers<[1], [0], [0], [1], [0, 0, 1, 1], [], []>} : vector<2x320xf32>, vector<320x512xf32>, vector<2x512xf32> -> vector<2x512xf32>
    %72 = vector.broadcast %2 : vector<1x512xf32> to vector<2x512xf32>
    %73 = arith.addf %71, %72 : vector<2x512xf32>
    %cst_11 = arith.constant 0.000000e+00 : f32
    %74 = vector.broadcast %cst_11 : f32 to vector<2x512xf32>
    %75 = arith.maximumf %73, %74 : vector<2x512xf32>
    %c0_12 = arith.constant 0 : index
    %c0_13 = arith.constant 0 : index
    %76 = vector.load %arg3[%c0_12, %c0_13] : memref<512x256xf32, #tpu.memory_space<vmem>>, vector<512x256xf32>
    %cst_14 = arith.constant dense<0.000000e+00> : vector<2x256xf32>
    %77 = tpu.matmul %75, %76, %cst_14 {dimension_numbers = #tpu.dot_dimension_numbers<[1], [0], [0], [1], [0, 0, 1, 1], [], []>} : vector<2x512xf32>, vector<512x256xf32>, vector<2x256xf32> -> vector<2x256xf32>
    %78 = vector.broadcast %3 : vector<1x256xf32> to vector<2x256xf32>
    %79 = arith.addf %77, %78 : vector<2x256xf32>
    %cst_15 = arith.constant 0.000000e+00 : f32
    %80 = vector.broadcast %cst_15 : f32 to vector<2x256xf32>
    %81 = arith.maximumf %79, %80 : vector<2x256xf32>
    %c0_16 = arith.constant 0 : index
    %c0_17 = arith.constant 0 : index
    %82 = vector.load %arg4[%c0_16, %c0_17] : memref<256x4xf32, #tpu.memory_space<vmem>>, vector<256x4xf32>
    %cst_18 = arith.constant dense<0.000000e+00> : vector<2x4xf32>
    %83 = tpu.matmul %81, %82, %cst_18 {dimension_numbers = #tpu.dot_dimension_numbers<[1], [0], [0], [1], [0, 0, 1, 1], [], []>} : vector<2x256xf32>, vector<256x4xf32>, vector<2x4xf32> -> vector<2x4xf32>
    %84 = vector.broadcast %4 : vector<1x4xf32> to vector<2x4xf32>
    %85 = arith.addf %83, %84 : vector<2x4xf32>
    %c0_19 = arith.constant 0 : index
    %c0_20 = arith.constant 0 : index
    %86 = vector.load %arg5[%c0_19, %c0_20] : memref<2x4xf32, #tpu.memory_space<vmem>>, vector<2x4xf32>
    tpu.vector_store %arg5[%c0_19, %c0_20], %85 {strides = array<i32>} : memref<2x4xf32, #tpu.memory_space<vmem>>, vector<2x4xf32>,
    return
  }
}

</mosaic_0001>

<bundles_post_ra>
// kernel: encoder_forward.1
= control target key start
LH: loop header
LB: loop body
LE: loop exit
PB: predicated region body
PF: predicated region fallthrough
CT: control target
= control target key end

     0   :  { %10 = vsyncpa [#allocation3], 0  ;;  %s2077_s0 = inlined_call_operand.vmem [shape: f32[8,32], index: 0, kind: input, shape index: {}]   ;;  %s2078_s1 = inlined_call_operand.vmem [shape: f32[16,512], index: 1, kind: input, shape index: {}]   ;;  %s2079_s2 = inlined_call_operand.hbm [shape: f32[320,512], index: 2, kind: input, shape index: {}]   ;;  %s2080_s3 = inlined_call_operand.hbm [shape: f32[512,256], index: 3, kind: input, shape index: {}]   ;;  %s2081_s4 = inlined_call_operand.vmem [shape: f32[256,4], index: 4, kind: input, shape index: {}]   ;;  %s2082_s5 = inlined_call_operand.vmem [shape: f32[2,4], index: 5, kind: output, shape index: {}]  }
   0x1   :  { %11 = vsyncpa [#allocation5], 0  ;;  %s1811_s18 = smov [#allocation2]   ;;  %s1763_s22 = scalar_lea.hbm %s2079_s2, 20480 }
   0x2   :  { %s21_s19 = sshll.u32 %s1811_s18, 4  ;;  %p1764_p0 = scmp.ne.s32.totalorder %s2079_s2, %s1763_s22  ;;  %s22_s19 = int_to_ptr.vmem [resolvable:$true] %s21_s19 }
   0x3   :  { %p1767_p1 = scmp.lt.u32.totalorder %s1763_s22, %s2079_s2 }
   0x5   :  { %p1769_p2 = pnand %p1767_p1, %p1764_p0 }
   0x7   :  { %1772 = shalt.err (!%p1769_p2)
}
   0x8   :  { %s1773_s27 = scalar_lea.vmem %s22_s19, 20480  ;;  %p1778_p4 = scmp.lt.s32.totalorder %s22_s19, %s22_s19 }
   0x9   :  { %p1774_p3 = scmp.ne.s32.totalorder %s22_s19, %s1773_s27  ;;  %p1779_p5 = scmp.lt.s32.totalorder %s1773_s27, %s1773_s27 }
   0xb   :  { %p1780_p6 = por %p1779_p5, %p1778_p4 }
   0xd   :  { %p1781_p7 = pnand %p1780_p6, %p1774_p3 }
   0xf   :  { %1784 = shalt.err (!%p1781_p7)
}
  0x10   :  { %s1812_s28 = smov 512   ;;  %s1813_s29 = smov 32  }
  0x11   :  { %27 = dma.hbm_to_vmem [thread:$0]  %s2079_s2, 20480, %s22_s19, [#allocation3], %s1812_s28, %s1812_s28, %s1813_s29  }
  0x12   :  { %s1814_s7 = smov [#allocation4]   ;;  %s1785_s11 = scalar_lea.hbm %s2080_s3, 16384 }
  0x13   :  { %s33_s8 = sshll.u32 %s1814_s7, 4  ;;  %p1786_p8 = scmp.ne.s32.totalorder %s2080_s3, %s1785_s11  ;;  %s34_s8 = int_to_ptr.vmem [resolvable:$true] %s33_s8 }
  0x14   :  { %p1789_p9 = scmp.lt.u32.totalorder %s1785_s11, %s2080_s3 }
  0x16   :  { %p1791_p10 = pnand %p1789_p9, %p1786_p8 }
  0x18   :  { %1794 = shalt.err (!%p1791_p10)
}
  0x19   :  { %s1795_s16 = scalar_lea.vmem %s34_s8, 16384  ;;  %p1800_p12 = scmp.lt.s32.totalorder %s34_s8, %s34_s8 }
  0x1a   :  { %p1796_p11 = scmp.ne.s32.totalorder %s34_s8, %s1795_s16  ;;  %p1801_p13 = scmp.lt.s32.totalorder %s1795_s16, %s1795_s16 }
  0x1c   :  { %p1802_p0 = por %p1801_p13, %p1800_p12 }
  0x1e   :  { %p1803_p1 = pnand %p1802_p0, %p1796_p11 }
  0x20   :  { %1806 = shalt.err (!%p1803_p1)
}
  0x21   :  { %s1815_s2 = smov 256   ;;  %s1816_s17 = smov 16  }
  0x22   :  { %39 = dma.hbm_to_vmem [thread:$0]  %s2080_s3, 16384, %s34_s8, [#allocation5], %s1815_s2, %s1815_s2, %s1816_s17  }
  0x23   :  { %1807 = dma.done.wait [#allocation3], 20480  }
  0x24   :  { %1808 = vsyncadd [#allocation3], 4294946816 }
  0x25   :  { %1809 = dma.done.wait [#allocation5], 16384  }
  0x26   :  { %1810 = vsyncadd [#allocation5], 4294950912  ;;  %vm54_vm0 = vcmask 261120   ;;  %v53_v0 = vld [vmem:[%s2077_s0] sm:$0xff]  ;;  %s1817_s22 = smov 127   ;;  %s1818_s23 = smov 125  }
  0x27   :  { %v55_v1 = vsel %vm54_vm0, %v53_v0, 0.0  ;;  %s1819_s24 = smov 126   ;;  %s1820_s3 = smov 124   ;;  %v48_v5 = vld [vmem:[%s2078_s1] sm:$0xff]  ;;  %vm91_vm1 = vcmask 334848   ;;  %vm85_vm2 = vcmask 1043456  }
  0x28   :  { %v57_v2 = vrot.slane %v55_v1, 4  ;;  %s1821_s25 = smov 123   ;;  %s1822_s26 = smov 122   ;;  %1304 = vmatprep.mubr.msk.f32.mxu0 %vm91_vm1, %v48_v5  ;;  %1319 = vmatprep.mubr.msk.f32.mxu1 %vm91_vm1, %v48_v5  ;;  %vm98_vm3 = vcmask 1040384   ;;  %vm1826_vm4 = vmmov 1   ;;  %v1827_v47 = vmov 1.0  }
  0x29   :  { %s1823_s0 = smov 121   ;;  %s1824_s30 = smov 120   ;;  %vm1331_vm5 = vmpackc.low %vm98_vm3, %vm1826_vm4  ;;  %v49_v50 = vld [vmem:[%s2078_s1 + $0x20] sm:$0xff]  ;;  %v373_v51 = vld [vmem:[#allocation2 + $0x8] sm:$0xff]  ;;  %vm364_vm6 = vcmask 523264   ;;  %vm366_vm7 = vcmask 785408  }
  0x2a   :  { %v1702_v3 = vpack.i.bf16 %v55_v1, %v57_v2  ;;  %v1707_v4 = vpack.i.bf16 %v57_v2, %v55_v1  ;;  %s1825_s6 = smov 119   ;;  %v377_v52 = vld [vmem:[#allocation2 + $0x28] sm:$0xff]  ;;  %v372_v53 = vld [vmem:[#allocation2] sm:$0xff]  ;;  %s1829_s9 = smov 64   ;;  %vm1225_vm8 = vcmask 25600  }
  0x2b   :  { %v1350_v54 = vpack.c.bf16 %v377_v52, %v373_v51  ;;  %v376_v55 = vld [vmem:[#allocation2 + $0x20] sm:$0xff]  ;;  %v381_v56 = vld [vmem:[#allocation2 + $0x48] sm:$0xff]  ;;  %s1830_s10 = smov 96  }
  0x2c   :  { %1703 = vrot.lane.b32.xlu0 %v1702_v3, %s1817_s22  ;;  %1713 = vrot.lane.b32.xlu1 %v1702_v3, %s1818_s23  ;;  %v385_v57 = vld [vmem:[#allocation2 + $0x68] sm:$0xff]  ;;  %v1352_v58 = vpack.c.bf16 %v376_v55, %v372_v53  ;;  %v380_v60 = vld [vmem:[#allocation2 + $0x40] sm:$0xff] }
  0x2d   :  { %v1354_v59 = vpack.c.bf16 %v385_v57, %v381_v56  ;;  %v384_v61 = vld [vmem:[#allocation2 + $0x60] sm:$0xff]  ;;  %v389_v62 = vld [vmem:[#allocation2 + $0x88] sm:$0xff] }
  0x2e   :  { %v393_v63 = vld [vmem:[#allocation2 + $0xa8] sm:$0xff]  ;;  %v1356_v0 = vpack.c.bf16 %v384_v61, %v380_v60  ;;  %v432_v51 = vld [vmem:[#allocation2 + $0x1e0] sm:$0xff] }
  0x2f   :  { %v401_v5 = vld [vmem:[#allocation2 + $0xe8] sm:$0xff]  ;;  %v436_v56 = vld [vmem:[#allocation2 + $0x200] sm:$0xff] }
  0x30   :  { %1708 = vrot.lane.b32.xlu0 %v1707_v4, %s1819_s24  ;;  %1718 = vrot.lane.b32.xlu1 %v1707_v4, %s1820_s3  ;;  %v437_v52 = vld [vmem:[#allocation2 + $0x208] sm:$0xff]  ;;  %v440_v57 = vld [vmem:[#allocation2 + $0x220] sm:$0xff] }
  0x31   :  { %v441_v53 = vld [vmem:[#allocation2 + $0x228] sm:$0xff]  ;;  %v1384_v60 = vpack.c.bf16 %v440_v57, %v436_v56 }
  0x32   :  { %v1382_v55 = vpack.c.bf16 %v441_v53, %v437_v52  ;;  %v507_v52 = vld [vmem:[#allocation2 + $0x438] sm:$0xff] }
  0x34   :  { %1723 = vrot.lane.b32.xlu0 %v1702_v3, %s1821_s25  ;;  %1728 = vrot.lane.b32.xlu1 %v1707_v4, %s1822_s26 }
  0x38   :  { %1733 = vrot.lane.b32.xlu0 %v1702_v3, %s1823_s0  ;;  %1738 = vrot.lane.b32.xlu1 %v1707_v4, %s1824_s30  ;;  %v397_v4 = vld [vmem:[#allocation2 + $0xc8] sm:$0xff] }
  0x3c   :  { %1743 = vrot.lane.b32.xlu0 %v1702_v3, %s1825_s6  ;;  %v392_v3 = vld [vmem:[#allocation2 + $0xa0] sm:$0xff] }
  0x9e   :  { %v1704_v6 = vpop.permute.xlu0 %1703  ;;  %v1714_v7 = vpop.permute.xlu1 %1713 }
  0x9f   :  { %v1706_v8 = vunpack.i.h.bf16 %v1704_v6  ;;  %v1705_v9 = vunpack.i.l.bf16 %v1704_v6  ;;  %v1716_v10 = vunpack.i.h.bf16 %v1714_v7  ;;  %v1715_v11 = vunpack.i.l.bf16 %v1714_v7 }
  0xa0   :  { %v1362_v7 = vpack.c.bf16 %v401_v5, %v397_v4  ;;  %v452_v4 = vld [vmem:[#allocation2 + $0x280] sm:$0xff] }
  0xa1   :  { %v86_v16 = vsel %vm85_vm2, %v55_v1, %v1705_v9  ;;  %v207_v18 = vsel %vm85_vm2, %v57_v2, %v1706_v8  ;;  %v1358_v1 = vpack.c.bf16 %v393_v63, %v389_v62  ;;  %v388_v2 = vld [vmem:[#allocation2 + $0x80] sm:$0xff] }
  0xa2   :  { %v1709_v12 = vpop.permute.xlu0 %1708  ;;  %v1719_v13 = vpop.permute.xlu1 %1718  ;;  %v1360_v6 = vpack.c.bf16 %v392_v3, %v388_v2  ;;  %v396_v8 = vld [vmem:[#allocation2 + $0xc0] sm:$0xff] }
  0xa3   :  { %v1711_v14 = vunpack.i.h.bf16 %v1709_v12  ;;  %v1710_v15 = vunpack.i.l.bf16 %v1709_v12  ;;  %v1721_v24 = vunpack.i.h.bf16 %v1719_v13  ;;  %v1720_v25 = vunpack.i.l.bf16 %v1719_v13  ;;  %v400_v9 = vld [vmem:[#allocation2 + $0xe0] sm:$0xff] }
  0xa4   :  { %v1364_v12 = vpack.c.bf16 %v400_v9, %v396_v8  ;;  %v444_v62 = vld [vmem:[#allocation2 + $0x240] sm:$0xff] }
  0xa5   :  { %v87_v17 = vsel %vm85_vm2, %v1710_v15, %v1715_v11  ;;  %v208_v19 = vsel %vm85_vm2, %v1711_v14, %v1716_v10  ;;  %v405_v10 = vld [vmem:[#allocation2 + $0x108] sm:$0xff]  ;;  %v404_v14 = vld [vmem:[#allocation2 + $0x100] sm:$0xff] }
  0xa6   :  { %v1724_v20 = vpop.permute.xlu0 %1723  ;;  %v1322_v21 = vpack.c.bf16 %v87_v17, %v86_v16  ;;  %v1336_v22 = vpack.c.bf16 %v208_v19, %v207_v18  ;;  %v1729_v23 = vpop.permute.xlu1 %1728  ;;  %v409_v11 = vld [vmem:[#allocation2 + $0x128] sm:$0xff]  ;;  %v408_v15 = vld [vmem:[#allocation2 + $0x120] sm:$0xff] }
  0xa7   :  { %v1726_v26 = vunpack.i.h.bf16 %v1724_v20  ;;  %v1725_v27 = vunpack.i.l.bf16 %v1724_v20  ;;  %v1731_v28 = vunpack.i.h.bf16 %v1729_v23  ;;  %v1730_v29 = vunpack.i.l.bf16 %v1729_v23  ;;  %v413_v16 = vld [vmem:[#allocation2 + $0x148] sm:$0xff]  ;;  %v412_v23 = vld [vmem:[#allocation2 + $0x140] sm:$0xff] }
  0xa8   :  { %1323 = vmatprep.subr.bf16.mxu0 %v1322_v21  ;;  %1337 = vmatprep.subr.bf16.mxu1 %v1336_v22  ;;  %v1366_v13 = vpack.c.bf16 %v409_v11, %v405_v10  ;;  %v417_v17 = vld [vmem:[#allocation2 + $0x168] sm:$0xff]  ;;  %v1368_v18 = vpack.c.bf16 %v408_v15, %v404_v14  ;;  %v448_v63 = vld [vmem:[#allocation2 + $0x260] sm:$0xff] }
  0xa9   :  { %1325 = vmatpush3.bf16.msra.mxu0 %v1322_v21  ;;  %1339 = vmatpush3.bf16.msra.mxu1 %v1336_v22  ;;  %v88_v34 = vsel %vm85_vm2, %v1720_v25, %v1725_v27  ;;  %v209_v35 = vsel %vm85_vm2, %v1721_v24, %v1726_v26  ;;  %v501_v19 = vld [vmem:[#allocation2 + $0x408] sm:$0xff]  ;;  %v500_v21 = vld [vmem:[#allocation2 + $0x400] sm:$0xff]  ;;  %v1370_v22 = vpack.c.bf16 %v417_v17, %v413_v16 }
  0xaa   :  { %v1734_v30 = vpop.permute.xlu0 %1733  ;;  %v1739_v31 = vpop.permute.xlu1 %1738  ;;  %v505_v20 = vld [vmem:[#allocation2 + $0x428] sm:$0xff]  ;;  %v416_v24 = vld [vmem:[#allocation2 + $0x160] sm:$0xff]  ;;  %v1388_v2 = vpack.c.bf16 %v448_v63, %v444_v62 }
  0xab   :  { %v1736_v32 = vunpack.i.h.bf16 %v1734_v30  ;;  %v1735_v33 = vunpack.i.l.bf16 %v1734_v30  ;;  %v1741_v36 = vunpack.i.h.bf16 %v1739_v31  ;;  %v1740_v37 = vunpack.i.l.bf16 %v1739_v31  ;;  %v504_v26 = vld [vmem:[#allocation2 + $0x420] sm:$0xff]  ;;  %v421_v27 = vld [vmem:[#allocation2 + $0x188] sm:$0xff] }
  0xac   :  { %v1414_v25 = vpack.c.bf16 %v505_v20, %v501_v19  ;;  %v509_v30 = vld [vmem:[#allocation2 + $0x448] sm:$0xff]  ;;  %v456_v5 = vld [vmem:[#allocation2 + $0x2a0] sm:$0xff] }
  0xad   :  { %v89_v38 = vsel %vm85_vm2, %v1730_v29, %v1735_v33  ;;  %v210_v39 = vsel %vm85_vm2, %v1731_v28, %v1736_v32  ;;  %v425_v28 = vld [vmem:[#allocation2 + $0x1a8] sm:$0xff]  ;;  %v1416_v29 = vpack.c.bf16 %v504_v26, %v500_v21  ;;  %v508_v32 = vld [vmem:[#allocation2 + $0x440] sm:$0xff]  ;;  %v1392_v8 = vpack.c.bf16 %v456_v5, %v452_v4 }
  0xae   :  { %v1744_v40 = vpop.permute.xlu0 %1743  ;;  %v1326_v41 = vpack.c.bf16 %v89_v38, %v88_v34  ;;  %v1340_v42 = vpack.c.bf16 %v210_v39, %v209_v35  ;;  %v513_v31 = vld [vmem:[#allocation2 + $0x468] sm:$0xff]  ;;  %v512_v33 = vld [vmem:[#allocation2 + $0x460] sm:$0xff]  ;;  %v1372_v34 = vpack.c.bf16 %v416_v24, %v412_v23  ;;  %v1374_v39 = vpack.c.bf16 %v425_v28, %v421_v27 }
  0xaf   :  { %v1746_v43 = vunpack.i.h.bf16 %v1744_v40  ;;  %v1745_v44 = vunpack.i.l.bf16 %v1744_v40  ;;  %v420_v35 = vld [vmem:[#allocation2 + $0x180] sm:$0xff]  ;;  %v1420_v38 = vpack.c.bf16 %v512_v33, %v508_v32  ;;  %v429_v40 = vld [vmem:[#allocation2 + $0x1c8] sm:$0xff] }
  0xb0   :  { %1327 = vmatprep.subr.bf16.mxu0 %v1326_v41  ;;  %1341 = vmatprep.subr.bf16.mxu1 %v1340_v42  ;;  %v460_v10 = vld [vmem:[#allocation2 + $0x2c0] sm:$0xff]  ;;  %v481_v19 = vld [vmem:[#allocation2 + $0x368] sm:$0xff] }
  0xb1   :  { %v211_v45 = vsel %vm85_vm2, %v1741_v36, %v1746_v43  ;;  %v90_v46 = vsel %vm85_vm2, %v1740_v37, %v1745_v44  ;;  %1329 = vmatpush3.bf16.msra.mxu0 %v1326_v41  ;;  %1343 = vmatpush3.bf16.msra.mxu1 %v1340_v42  ;;  %v424_v36 = vld [vmem:[#allocation2 + $0x1a0] sm:$0xff]  ;;  %v1418_v37 = vpack.c.bf16 %v513_v31, %v509_v30  ;;  %v517_v41 = vld [vmem:[#allocation2 + $0x488] sm:$0xff] }
  0xb2   :  { %v1344_v48 = vpack.c.bf16 %v1827_v47, %v211_v45  ;;  %v1330_v49 = vpack.c.bf16 %v1827_v47, %v90_v46  ;;  %v521_v42 = vld [vmem:[#allocation2 + $0x4a8] sm:$0xff]  ;;  %v516_v45 = vld [vmem:[#allocation2 + $0x480] sm:$0xff]  ;;  %v1376_v47 = vpack.c.bf16 %v424_v36, %v420_v35 }
  0xb3   :  { %v433_v43 = vld [vmem:[#allocation2 + $0x1e8] sm:$0xff]  ;;  %v1422_v44 = vpack.c.bf16 %v521_v42, %v517_v41  ;;  %v520_v46 = vld [vmem:[#allocation2 + $0x4a0] sm:$0xff] }
  0xb4   :  { %1332 = vmatprep.subr.msk.bf16.mxu0 %vm1331_vm5, %v1330_v49  ;;  %1346 = vmatprep.subr.msk.bf16.mxu1 %vm1331_vm5, %v1344_v48  ;;  %v464_v11 = vld [vmem:[#allocation2 + $0x2e0] sm:$0xff]  ;;  %v485_v24 = vld [vmem:[#allocation2 + $0x388] sm:$0xff] }
  0xb5   :  { %1335 = vmatpush3.bf16.msk.msra.mxu0 %vm1331_vm5, %v1330_v49  ;;  %1349 = vmatpush3.bf16.msk.msra.mxu1 %vm1331_vm5, %v1344_v48  ;;  %v1424_v48 = vpack.c.bf16 %v520_v46, %v516_v45  ;;  %v1378_v49 = vpack.c.bf16 %v433_v43, %v429_v40  ;;  %v1396_v14 = vpack.c.bf16 %v464_v11, %v460_v10  ;;  %v468_v16 = vld [vmem:[#allocation2 + $0x300] sm:$0xff]  ;;  %v525_v30 = vld [vmem:[#allocation2 + $0x4c8] sm:$0xff]  ;;  %v379_v10 = vld [vmem:[#allocation2 + $0x38] sm:$0xff] }
  0xb6   :  { %1351 = vmatprep.subr.bf16.mxu1 %v1350_v54  ;;  %1415 = vmatprep.subr.bf16.mxu0 %v1414_v25  ;;  %v472_v17 = vld [vmem:[#allocation2 + $0x320] sm:$0xff]  ;;  %v489_v25 = vld [vmem:[#allocation2 + $0x3a8] sm:$0xff] }
  0xb7   :  { %v1400_v20 = vpack.c.bf16 %v472_v17, %v468_v16  ;;  %v480_v23 = vld [vmem:[#allocation2 + $0x360] sm:$0xff]  ;;  %v1406_v27 = vpack.c.bf16 %v489_v25, %v485_v24  ;;  %v529_v32 = vld [vmem:[#allocation2 + $0x4e8] sm:$0xff]  ;;  %v502_v24 = vld [vmem:[#allocation2 + $0x410] sm:$0xff] }
  0xb8   :  { %1305 = vmatmul.mubr.msk.f32.vlgmr.msra.gmra.mrb[0].mxu0 %vm91_vm1, %v49_v50  ;;  %1320 = vmatmul.mubr.msk.f32.vlgmr.msra.gmra.mrb[0].mxu1 %vm91_vm1, %v49_v50  ;;  %v428_v50 = vld [vmem:[#allocation2 + $0x1c0] sm:$0xff]  ;;  %v1426_v35 = vpack.c.bf16 %v529_v32, %v525_v30  ;;  %v506_v25 = vld [vmem:[#allocation2 + $0x430] sm:$0xff] }
  0xb9   :  { %1353 = vmatpush1.bf16.msra.mxu1 %v1352_v58  ;;  %1417 = vmatpush1.bf16.msra.mxu0 %v1416_v29  ;;  %v1380_v54 = vpack.c.bf16 %v432_v51, %v428_v50  ;;  %v445_v58 = vld [vmem:[#allocation2 + $0x248] sm:$0xff]  ;;  %v484_v28 = vld [vmem:[#allocation2 + $0x380] sm:$0xff]  ;;  %v503_v51 = vld [vmem:[#allocation2 + $0x418] sm:$0xff] }
  0xba   :  { %1355 = vmatprep.subr.bf16.mxu1 %v1354_v59  ;;  %1419 = vmatprep.subr.bf16.mxu0 %v1418_v37  ;;  %v449_v59 = vld [vmem:[#allocation2 + $0x268] sm:$0xff]  ;;  %v488_v29 = vld [vmem:[#allocation2 + $0x3a0] sm:$0xff]  ;;  %v1494_v56 = vpack.c.bf16 %v507_v52, %v503_v51 }
  0xbb   :  { %v1386_v61 = vpack.c.bf16 %v449_v59, %v445_v58  ;;  %v1408_v31 = vpack.c.bf16 %v488_v29, %v484_v28  ;;  %v524_v33 = vld [vmem:[#allocation2 + $0x4c0] sm:$0xff]  ;;  %v493_v37 = vld [vmem:[#allocation2 + $0x3c8] sm:$0xff]  ;;  %v515_v28 = vld [vmem:[#allocation2 + $0x478] sm:$0xff] }
  0xbc   :  { %v492_v46 = vld [vmem:[#allocation2 + $0x3c0] sm:$0xff] }
  0xbd   :  { %1357 = vmatpush1.bf16.msra.mxu1 %v1356_v0  ;;  %1421 = vmatpush1.bf16.msra.mxu0 %v1420_v38  ;;  %v453_v0 = vld [vmem:[#allocation2 + $0x288] sm:$0xff] }
  0xbe   :  { %1359 = vmatprep.subr.bf16.mxu1 %v1358_v1  ;;  %1423 = vmatprep.subr.bf16.mxu0 %v1422_v44  ;;  %v457_v1 = vld [vmem:[#allocation2 + $0x2a8] sm:$0xff] }
  0xbf   :  { %v1390_v3 = vpack.c.bf16 %v457_v1, %v453_v0  ;;  %v497_v38 = vld [vmem:[#allocation2 + $0x3e8] sm:$0xff] }
  0xc0   :  { %v1410_v41 = vpack.c.bf16 %v497_v38, %v493_v37  ;;  %v374_v37 = vld [vmem:[#allocation2 + $0x10] sm:$0xff] }
  0xc1   :  { %1361 = vmatpush1.bf16.msra.mxu1 %v1360_v6  ;;  %1425 = vmatpush1.bf16.msra.mxu0 %v1424_v48  ;;  %v461_v6 = vld [vmem:[#allocation2 + $0x2c8] sm:$0xff]  ;;  %v378_v38 = vld [vmem:[#allocation2 + $0x30] sm:$0xff] }
  0xc2   :  { %1363 = vmatprep.subr.bf16.mxu1 %v1362_v7  ;;  %v465_v7 = vld [vmem:[#allocation2 + $0x2e8] sm:$0xff]  ;;  %1427 = vmatprep.subr.bf16.mxu0 %v1426_v35  ;;  %v1432_v52 = vpack.c.bf16 %v378_v38, %v374_v37  ;;  %v850_v37 = vld [vmem:[#allocation4 + $0x58] sm:$0xff] }
  0xc3   :  { %v1394_v9 = vpack.c.bf16 %v465_v7, %v461_v6 }
  0xc5   :  { %1365 = vmatpush1.bf16.msra.mxu1 %v1364_v12  ;;  %v469_v12 = vld [vmem:[#allocation2 + $0x308] sm:$0xff] }
  0xc6   :  { %1367 = vmatprep.subr.bf16.mxu1 %v1366_v13  ;;  %v473_v13 = vld [vmem:[#allocation2 + $0x328] sm:$0xff] }
  0xc7   :  { %v1398_v15 = vpack.c.bf16 %v473_v13, %v469_v12 }
  0xc9   :  { %1369 = vmatpush1.bf16.msra.mxu1 %v1368_v18  ;;  %v477_v18 = vld [vmem:[#allocation2 + $0x348] sm:$0xff] }
  0xca   :  { %1371 = vmatprep.subr.bf16.mxu1 %v1370_v22  ;;  %v1402_v21 = vpack.c.bf16 %v481_v19, %v477_v18  ;;  %v476_v22 = vld [vmem:[#allocation2 + $0x340] sm:$0xff] }
  0xcb   :  { %v1404_v26 = vpack.c.bf16 %v480_v23, %v476_v22 }
  0xcd   :  { %1373 = vmatpush1.bf16.msra.mxu1 %v1372_v34  ;;  %v528_v34 = vld [vmem:[#allocation2 + $0x4e0] sm:$0xff] }
  0xce   :  { %1375 = vmatprep.subr.bf16.mxu1 %v1374_v39  ;;  %v1428_v36 = vpack.c.bf16 %v528_v34, %v524_v33  ;;  %v1496_v33 = vpack.c.bf16 %v506_v25, %v502_v24  ;;  %v844_v24 = vld [vmem:[#allocation4 + $0x28] sm:$0xff]  ;;  %v846_v25 = vld [vmem:[#allocation4 + $0x38] sm:$0xff] }
  0xd0   :  { %1429 = vmatpush1.bf16.msra.mxu0 %v1428_v36 }
  0xd1   :  { %1377 = vmatpush1.bf16.msra.mxu1 %v1376_v47  ;;  %v496_v47 = vld [vmem:[#allocation2 + $0x3e0] sm:$0xff]  ;;  %1495 = vmatprep.subr.bf16.mxu0 %v1494_v56 }
  0xd2   :  { %1379 = vmatprep.subr.bf16.mxu1 %v1378_v49  ;;  %v1412_v50 = vpack.c.bf16 %v496_v47, %v492_v46 }
  0xd5   :  { %1381 = vmatpush1.bf16.msra.mxu1 %v1380_v54 }
  0xd6   :  { %1383 = vmatprep.subr.bf16.mxu1 %v1382_v55  ;;  %v1828_v55 = vmov 0.0  }
  0xd7   :  { %686 = vmatprep.mubr.f32.mxu0 %v1828_v55 }
  0xd9   :  { %1385 = vmatpush1.bf16.msra.mxu1 %v1384_v60 }
  0xda   :  { %1387 = vmatprep.subr.bf16.mxu1 %v1386_v61 }
  0xdd   :  { %1389 = vmatpush1.bf16.msra.mxu1 %v1388_v2 }
  0xde   :  { %1391 = vmatprep.subr.bf16.mxu1 %v1390_v3 }
  0xe1   :  { %1393 = vmatpush1.bf16.msra.mxu1 %v1392_v8 }
  0xe2   :  { %1395 = vmatprep.subr.bf16.mxu1 %v1394_v9  ;;  %v375_v9 = vld [vmem:[#allocation2 + $0x18] sm:$0xff] }
  0xe5   :  { %1397 = vmatpush1.bf16.msra.mxu1 %v1396_v14 }
  0xe6   :  { %1399 = vmatprep.subr.bf16.mxu1 %v1398_v15 }
  0xe9   :  { %1401 = vmatpush1.bf16.msra.mxu1 %v1400_v20  ;;  %v1430_v20 = vpack.c.bf16 %v379_v10, %v375_v9  ;;  %v530_v9 = vld [vmem:[#allocation2 + $0x4f0] sm:$0xff]  ;;  %v399_v10 = vld [vmem:[#allocation2 + $0xd8] sm:$0xff] }
  0xea   :  { %1403 = vmatprep.subr.bf16.mxu1 %v1402_v21 }
  0xed   :  { %1405 = vmatpush1.bf16.msra.mxu1 %v1404_v26 }
  0xee   :  { %1407 = vmatprep.subr.bf16.mxu1 %v1406_v27  ;;  %v511_v27 = vld [vmem:[#allocation2 + $0x458] sm:$0xff] }
  0xf1   :  { %1409 = vmatpush1.bf16.msra.mxu1 %v1408_v31 }
  0xf2   :  { %1411 = vmatprep.subr.bf16.mxu1 %v1410_v41 }
  0xf5   :  { %1413 = vmatpush1.bf16.msra.mxu1 %v1412_v50 }
  0xf6   :  { %1431 = vmatprep.subr.bf16.mxu1 %v1430_v20  ;;  %v411_v20 = vld [vmem:[#allocation2 + $0x138] sm:$0xff] }
 0x18b   :  { %v1306_v39 = vpop.f32.mrb[0].mxu0  ;;  %v1321_v40 = vpop.f32.mrb[0].mxu1 }
 0x18c   :  { %v178_v42 = vmax.f32 %v1306_v39, 0.0  ;;  %v288_v43 = vmax.f32 %v1321_v40, 0.0  ;;  %v168_v44 = vpop.f32.mrb[1].mxu0  ;;  %v278_v45 = vpop.f32.mrb[1].mxu1  ;;  %v1498_v39 = vpack.c.bf16 %v515_v28, %v511_v27  ;;  %v510_v40 = vld [vmem:[#allocation2 + $0x450] sm:$0xff] }
 0x18d   :  { %v177_v48 = vmax.f32 %v168_v44, 0.0  ;;  %v287_v49 = vmax.f32 %v278_v45, 0.0  ;;  %v383_v44 = vld [vmem:[#allocation2 + $0x58] sm:$0xff]  ;;  %v406_v28 = vld [vmem:[#allocation2 + $0x110] sm:$0xff] }
 0x18e   :  { %v332_v53 = vrot.slane %v178_v42, 1  ;;  %v328_v54 = vrot.slane %v288_v43, 7  ;;  %v387_v45 = vld [vmem:[#allocation2 + $0x78] sm:$0xff] }
 0x18f   :  { %v297_v57 = vrot.slane %v177_v48, 2  ;;  %v299_v58 = vrot.slane %v287_v49, 1  ;;  %v317_v59 = vrot.slane %v177_v48, 6  ;;  %v319_v60 = vrot.slane %v287_v49, 5 }
 0x190   :  { %v294_v61 = vrot.slane %v177_v48, 1  ;;  %v312_v62 = vrot.slane %v177_v48, 5  ;;  %v314_v63 = vrot.slane %v287_v49, 4  ;;  %v334_v0 = vsel %vm98_vm3, %v332_v53, %v288_v43  ;;  %v514_v43 = vld [vmem:[#allocation2 + $0x470] sm:$0xff] }
 0x191   :  { %v301_v1 = vsel %vm98_vm3, %v297_v57, %v299_v58  ;;  %v321_v2 = vsel %vm98_vm3, %v317_v59, %v319_v60  ;;  %v302_v3 = vrot.slane %v177_v48, 3  ;;  %v304_v4 = vrot.slane %v287_v49, 2  ;;  %v382_v58 = vld [vmem:[#allocation2 + $0x50] sm:$0xff] }
 0x192   :  { %v1752_v5 = vpack.i.bf16 %v301_v1, %v321_v2  ;;  %v296_v6 = vsel %vm98_vm3, %v294_v61, %v287_v49  ;;  %v316_v7 = vsel %vm98_vm3, %v312_v62, %v314_v63  ;;  %v322_v8 = vrot.slane %v177_v48, 7  ;;  %v386_v59 = vld [vmem:[#allocation2 + $0x70] sm:$0xff]  ;;  %v391_v63 = vld [vmem:[#allocation2 + $0x98] sm:$0xff] }
 0x193   :  { %v1747_v11 = vpack.i.bf16 %v296_v6, %v316_v7  ;;  %v306_v12 = vsel %vm98_vm3, %v302_v3, %v304_v4  ;;  %v324_v13 = vrot.slane %v287_v49, 6  ;;  %v290_v14 = vrot.slane %v287_v49, 7  ;;  %v518_v60 = vld [vmem:[#allocation2 + $0x490] sm:$0xff]  ;;  %v527_v1 = vld [vmem:[#allocation2 + $0x4d8] sm:$0xff] }
 0x194   :  { %1753 = vrot.lane.b32.xlu0 %v1752_v5, %s1829_s9  ;;  %v330_v15 = vsel %vm98_vm3, %v178_v42, %v328_v54  ;;  %v307_v16 = vrot.slane %v177_v48, 4  ;;  %v309_v17 = vrot.slane %v287_v49, 3  ;;  %v523_v49 = vld [vmem:[#allocation2 + $0x4b8] sm:$0xff]  ;;  %v1500_v56 = vpack.c.bf16 %v514_v43, %v510_v40  ;;  %v522_v62 = vld [vmem:[#allocation2 + $0x4b0] sm:$0xff] }
 0x195   :  { %1748 = vrot.lane.b32.xlu1 %v1747_v11, %s1813_s29  ;;  %v326_v18 = vsel %vm98_vm3, %v322_v8, %v324_v13  ;;  %v292_v19 = vsel %vm98_vm3, %v177_v48, %v290_v14  ;;  %v519_v48 = vld [vmem:[#allocation2 + $0x498] sm:$0xff]  ;;  %v1434_v57 = vpack.c.bf16 %v387_v45, %v383_v44  ;;  %v1504_v3 = vpack.c.bf16 %v522_v62, %v518_v60  ;;  %v390_v5 = vld [vmem:[#allocation2 + $0x90] sm:$0xff]  ;;  %v851_v60 = vld [vmem:[#allocation4 + $0x60] sm:$0xff] }
 0x196   :  { %v1757_v21 = vpack.i.bf16 %v306_v12, %v326_v18  ;;  %v311_v22 = vsel %vm98_vm3, %v307_v16, %v309_v17  ;;  %v1502_v61 = vpack.c.bf16 %v523_v49, %v519_v48  ;;  %v531_v2 = vld [vmem:[#allocation2 + $0x4f8] sm:$0xff]  ;;  %v394_v6 = vld [vmem:[#allocation2 + $0xb0] sm:$0xff]  ;;  %v840_v12 = vld [vmem:[#allocation4 + $0x8] sm:$0xff] }
 0x197   :  { %v526_v7 = vld [vmem:[#allocation2 + $0x4d0] sm:$0xff]  ;;  %v1506_v8 = vpack.c.bf16 %v531_v2, %v527_v1  ;;  %v403_v11 = vld [vmem:[#allocation2 + $0xf8] sm:$0xff]  ;;  %v1440_v14 = vpack.c.bf16 %v394_v6, %v390_v5  ;;  %v852_v49 = vld [vmem:[#allocation4 + $0x68] sm:$0xff] }
 0x198   :  { %360 = vrot.lane.b32.xlu0 %v334_v0, %s1813_s29  ;;  %v395_v0 = vld [vmem:[#allocation2 + $0xb8] sm:$0xff]  ;;  %v1442_v16 = vpack.c.bf16 %v403_v11, %v399_v10  ;;  %v398_v17 = vld [vmem:[#allocation2 + $0xd0] sm:$0xff]  ;;  %v856_v62 = vld [vmem:[#allocation4 + $0x88] sm:$0xff] }
 0x199   :  { %1758 = vrot.lane.b32.xlu1 %v1757_v21, %s1830_s10  ;;  %v1438_v4 = vpack.c.bf16 %v395_v0, %v391_v63  ;;  %v842_v13 = vld [vmem:[#allocation4 + $0x18] sm:$0xff]  ;;  %v402_v18 = vld [vmem:[#allocation2 + $0xf0] sm:$0xff] }
 0x19a   :  { %v1510_v21 = vpack.c.bf16 %v842_v13, %v840_v12  ;;  %v414_v40 = vld [vmem:[#allocation2 + $0x150] sm:$0xff]  ;;  %v423_v43 = vld [vmem:[#allocation2 + $0x198] sm:$0xff] }
 0x19b   :  { %v427_v45 = vld [vmem:[#allocation2 + $0x1b8] sm:$0xff]  ;;  %v849_v48 = vld [vmem:[#allocation4 + $0x50] sm:$0xff] }
 0x19c   :  { %v858_v63 = vld [vmem:[#allocation4 + $0x98] sm:$0xff]  ;;  %v430_v2 = vld [vmem:[#allocation2 + $0x1d0] sm:$0xff] }
 0x19d   :  { %v443_v5 = vld [vmem:[#allocation2 + $0x238] sm:$0xff]  ;;  %v1526_v6 = vpack.c.bf16 %v858_v63, %v856_v62  ;;  %v438_v13 = vld [vmem:[#allocation2 + $0x210] sm:$0xff] }
 0x19e   :  { %v862_v10 = vld [vmem:[#allocation4 + $0xb8] sm:$0xff]  ;;  %v470_v63 = vld [vmem:[#allocation2 + $0x310] sm:$0xff] }
 0x206   :  { %v1754_v23 = vpop.permute.xlu0 %1753 }
 0x207   :  { %v1749_v26 = vpop.permute.xlu1 %1748  ;;  %v1756_v31 = vunpack.i.h.bf16 %v1754_v23  ;;  %v1755_v32 = vunpack.i.l.bf16 %v1754_v23  ;;  %v841_v23 = vld [vmem:[#allocation4 + $0x10] sm:$0xff] }
 0x208   :  { %v1751_v29 = vunpack.i.h.bf16 %v1749_v26  ;;  %v1750_v30 = vunpack.i.l.bf16 %v1749_v26  ;;  %v1444_v26 = vpack.c.bf16 %v402_v18, %v398_v17  ;;  %v451_v17 = vld [vmem:[#allocation2 + $0x278] sm:$0xff] }
 0x20a   :  { %v363_v34 = vsel %vm54_vm0, %v292_v19, %v1751_v29  ;;  %v361_v35 = vpop.permute.xlu0 %360  ;;  %v368_v36 = vsel %vm54_vm0, %v311_v22, %v1750_v30  ;;  %v407_v19 = vld [vmem:[#allocation2 + $0x118] sm:$0xff]  ;;  %v839_v22 = vld [vmem:[#allocation4] sm:$0xff]  ;;  %v410_v29 = vld [vmem:[#allocation2 + $0x130] sm:$0xff] }
 0x20b   :  { %v1927_v41 = vsel %vm54_vm0, %v330_v15, %v361_v35  ;;  %v1759_v42 = vpop.permute.xlu1 %1758  ;;  %v369_v50 = vsel %vm364_vm6, %v368_v36, %v1755_v32  ;;  %v365_v51 = vsel %vm364_vm6, %v363_v34, %v1756_v31  ;;  %v1508_v15 = vpack.c.bf16 %v530_v9, %v526_v7  ;;  %v415_v30 = vld [vmem:[#allocation2 + $0x158] sm:$0xff]  ;;  %v843_v34 = vld [vmem:[#allocation4 + $0x20] sm:$0xff]  ;;  %v845_v35 = vld [vmem:[#allocation4 + $0x30] sm:$0xff] }
 0x20c   :  { %v1761_v46 = vunpack.i.h.bf16 %v1759_v42  ;;  %v1760_v47 = vunpack.i.l.bf16 %v1759_v42  ;;  %1239 = vmatmul.mubr.msk.f32.vlgmr.msra.gmra.mrb[2].mxu0 %vm364_vm6, %v1927_v41  ;;  %v1446_v27 = vpack.c.bf16 %v411_v20, %v407_v19  ;;  %v1512_v31 = vpack.c.bf16 %v841_v23, %v839_v22  ;;  %v419_v32 = vld [vmem:[#allocation2 + $0x178] sm:$0xff]  ;;  %v848_v36 = vld [vmem:[#allocation4 + $0x48] sm:$0xff]  ;;  %v418_v42 = vld [vmem:[#allocation2 + $0x170] sm:$0xff] }
 0x20d   :  { %1497 = vmatpush1.bf16.msra.mxu0 %v1496_v33  ;;  %828 = vmatprep.mubr.f32.mxu0 %v1828_v55  ;;  %v1436_v55 = vpack.c.bf16 %v386_v59, %v382_v58  ;;  %v1514_v33 = vpack.c.bf16 %v846_v25, %v844_v24  ;;  %v1448_v38 = vpack.c.bf16 %v410_v29, %v406_v28  ;;  %v435_v58 = vld [vmem:[#allocation2 + $0x1f8] sm:$0xff]  ;;  %v855_v7 = vld [vmem:[#allocation4 + $0x80] sm:$0xff]  ;;  %v860_v9 = vld [vmem:[#allocation4 + $0xa8] sm:$0xff] }
 0x20e   :  { %v370_v53 = vsel %vm366_vm7, %v369_v50, %v1760_v47  ;;  %v1934_v54 = vsel %vm366_vm7, %v365_v51, %v1761_v46  ;;  %1499 = vmatprep.subr.bf16.mxu0 %v1498_v39  ;;  %v1450_v39 = vpack.c.bf16 %v419_v32, %v415_v30  ;;  %v1516_v44 = vpack.c.bf16 %v845_v35, %v843_v34  ;;  %v847_v47 = vld [vmem:[#allocation4 + $0x40] sm:$0xff]  ;;  %v854_v50 = vld [vmem:[#allocation4 + $0x78] sm:$0xff]  ;;  %v861_v20 = vld [vmem:[#allocation4 + $0xb0] sm:$0xff] }
 0x20f   :  { %615 = vmatprep.mubr.f32.mxu1 %v370_v53  ;;  %v1518_v46 = vpack.c.bf16 %v850_v37, %v848_v36  ;;  %v1452_v51 = vpack.c.bf16 %v418_v42, %v414_v40  ;;  %v1522_v59 = vpack.c.bf16 %v854_v50, %v852_v49  ;;  %v1530_v18 = vpack.c.bf16 %v862_v10, %v860_v9  ;;  %v859_v19 = vld [vmem:[#allocation4 + $0xa0] sm:$0xff]  ;;  %v866_v22 = vld [vmem:[#allocation4 + $0xd8] sm:$0xff]  ;;  %v446_v25 = vld [vmem:[#allocation2 + $0x250] sm:$0xff] }
 0x210   :  { %616 = vmatmul.mubr.f32.vlgmr.msra.gmra.mrb[2].mxu1 %v1934_v54  ;;  %v1532_v28 = vpack.c.bf16 %v861_v20, %v859_v19  ;;  %v459_v29 = vld [vmem:[#allocation2 + $0x2b8] sm:$0xff]  ;;  %v865_v32 = vld [vmem:[#allocation4 + $0xd0] sm:$0xff] }
 0x211   :  { %1433 = vmatpush1.bf16.msra.mxu1 %v1432_v52  ;;  %757 = vmatprep.mubr.f32.mxu1 %v370_v53  ;;  %v1454_v52 = vpack.c.bf16 %v427_v45, %v423_v43  ;;  %v426_v53 = vld [vmem:[#allocation2 + $0x1b0] sm:$0xff]  ;;  %v870_v34 = vld [vmem:[#allocation4 + $0xf8] sm:$0xff] }
 0x212   :  { %1501 = vmatpush1.bf16.msra.mxu0 %v1500_v56  ;;  %1435 = vmatprep.subr.bf16.mxu1 %v1434_v57  ;;  %v431_v56 = vld [vmem:[#allocation2 + $0x1d8] sm:$0xff]  ;;  %v1520_v57 = vpack.c.bf16 %v849_v48, %v847_v47  ;;  %v454_v37 = vld [vmem:[#allocation2 + $0x290] sm:$0xff] }
 0x213   :  { %1503 = vmatprep.subr.bf16.mxu0 %v1502_v61  ;;  %v853_v61 = vld [vmem:[#allocation4 + $0x70] sm:$0xff]  ;;  %v1458_v1 = vpack.c.bf16 %v435_v58, %v431_v56  ;;  %v467_v42 = vld [vmem:[#allocation2 + $0x2f8] sm:$0xff] }
 0x214   :  { %v869_v45 = vld [vmem:[#allocation4 + $0xf0] sm:$0xff]  ;;  %v874_v47 = vld [vmem:[#allocation4 + $0x118] sm:$0xff] }
 0x215   :  { %1437 = vmatpush1.bf16.msra.mxu1 %v1436_v55  ;;  %v434_v55 = vld [vmem:[#allocation2 + $0x1f0] sm:$0xff]  ;;  %v886_v19 = vld [vmem:[#allocation4 + $0x178] sm:$0xff] }
 0x216   :  { %1505 = vmatpush1.bf16.msra.mxu0 %v1504_v3  ;;  %1439 = vmatprep.subr.bf16.mxu1 %v1438_v4  ;;  %v439_v3 = vld [vmem:[#allocation2 + $0x218] sm:$0xff]  ;;  %v1524_v4 = vpack.c.bf16 %v853_v61, %v851_v60  ;;  %v1460_v11 = vpack.c.bf16 %v434_v55, %v430_v2  ;;  %v462_v50 = vld [vmem:[#allocation2 + $0x2d0] sm:$0xff] }
 0x217   :  { %1507 = vmatprep.subr.bf16.mxu0 %v1506_v8  ;;  %v857_v8 = vld [vmem:[#allocation4 + $0x90] sm:$0xff]  ;;  %v1462_v12 = vpack.c.bf16 %v443_v5, %v439_v3  ;;  %v878_v60 = vld [vmem:[#allocation4 + $0x138] sm:$0xff] }
 0x218   :  { %v873_v58 = vld [vmem:[#allocation4 + $0x110] sm:$0xff]  ;;  %v483_v55 = vld [vmem:[#allocation2 + $0x378] sm:$0xff] }
 0x219   :  { %1441 = vmatpush1.bf16.msra.mxu1 %v1440_v14  ;;  %v442_v14 = vld [vmem:[#allocation2 + $0x230] sm:$0xff] }
 0x21a   :  { %1509 = vmatpush1.bf16.msra.mxu0 %v1508_v15  ;;  %1443 = vmatprep.subr.bf16.mxu1 %v1442_v16  ;;  %v447_v15 = vld [vmem:[#allocation2 + $0x258] sm:$0xff]  ;;  %v1528_v16 = vpack.c.bf16 %v857_v8, %v855_v7  ;;  %v1464_v23 = vpack.c.bf16 %v442_v14, %v438_v13  ;;  %v877_v5 = vld [vmem:[#allocation4 + $0x130] sm:$0xff] }
 0x21b   :  { %1511 = vmatprep.subr.bf16.mxu0 %v1510_v21  ;;  %v864_v21 = vld [vmem:[#allocation4 + $0xc8] sm:$0xff]  ;;  %v1466_v24 = vpack.c.bf16 %v451_v17, %v447_v15  ;;  %v882_v7 = vld [vmem:[#allocation4 + $0x158] sm:$0xff]  ;;  %v478_v10 = vld [vmem:[#allocation2 + $0x350] sm:$0xff] }
 0x21c   :  { %v1534_v30 = vpack.c.bf16 %v866_v22, %v864_v21  ;;  %v491_v14 = vld [vmem:[#allocation2 + $0x3b8] sm:$0xff]  ;;  %v881_v17 = vld [vmem:[#allocation4 + $0x150] sm:$0xff] }
 0x21d   :  { %1445 = vmatpush1.bf16.msra.mxu1 %v1444_v26  ;;  %1240 = vmatmul.mubr.msk.f32.vlgmr.msra.gmra.mrb[4].mxu0 %vm364_vm6, %v1927_v41  ;;  %v422_v41 = vld [vmem:[#allocation2 + $0x190] sm:$0xff] }
 0x21e   :  { %1447 = vmatprep.subr.bf16.mxu1 %v1446_v27  ;;  %1513 = vmatpush1.bf16.msra.mxu0 %v1512_v31  ;;  %v1456_v0 = vpack.c.bf16 %v426_v53, %v422_v41  ;;  %v450_v26 = vld [vmem:[#allocation2 + $0x270] sm:$0xff]  ;;  %v455_v27 = vld [vmem:[#allocation2 + $0x298] sm:$0xff]  ;;  %v863_v31 = vld [vmem:[#allocation4 + $0xc0] sm:$0xff] }
 0x21f   :  { %1515 = vmatprep.subr.bf16.mxu0 %v1514_v33  ;;  %v868_v33 = vld [vmem:[#allocation4 + $0xe8] sm:$0xff]  ;;  %v1468_v35 = vpack.c.bf16 %v450_v26, %v446_v25  ;;  %v1470_v36 = vpack.c.bf16 %v459_v29, %v455_v27  ;;  %v1536_v40 = vpack.c.bf16 %v865_v32, %v863_v31  ;;  %v475_v53 = vld [vmem:[#allocation2 + $0x338] sm:$0xff]  ;;  %v486_v22 = vld [vmem:[#allocation2 + $0x390] sm:$0xff] }
 0x220   :  { %v1538_v43 = vpack.c.bf16 %v870_v34, %v868_v33  ;;  %v499_v26 = vld [vmem:[#allocation2 + $0x3f8] sm:$0xff]  ;;  %v885_v29 = vld [vmem:[#allocation4 + $0x170] sm:$0xff] }
 0x221   :  { %1449 = vmatpush1.bf16.msra.mxu1 %v1448_v38  ;;  %v458_v38 = vld [vmem:[#allocation2 + $0x2b0] sm:$0xff]  ;;  %v890_v31 = vld [vmem:[#allocation4 + $0x198] sm:$0xff] }
 0x222   :  { %1451 = vmatprep.subr.bf16.mxu1 %v1450_v39  ;;  %1517 = vmatpush1.bf16.msra.mxu0 %v1516_v44  ;;  %v463_v39 = vld [vmem:[#allocation2 + $0x2d8] sm:$0xff]  ;;  %v867_v44 = vld [vmem:[#allocation4 + $0xe0] sm:$0xff]  ;;  %v1472_v48 = vpack.c.bf16 %v458_v38, %v454_v37  ;;  %v494_v34 = vld [vmem:[#allocation2 + $0x3d0] sm:$0xff] }
 0x223   :  { %1519 = vmatprep.subr.bf16.mxu0 %v1518_v46  ;;  %v872_v46 = vld [vmem:[#allocation4 + $0x108] sm:$0xff]  ;;  %v1474_v49 = vpack.c.bf16 %v467_v42, %v463_v39  ;;  %v1540_v41 = vpack.c.bf16 %v869_v45, %v867_v44  ;;  %v887_v38 = vld [vmem:[#allocation4 + $0x180] sm:$0xff]  ;;  %v889_v39 = vld [vmem:[#allocation4 + $0x190] sm:$0xff] }
 0x224   :  { %v1542_v56 = vpack.c.bf16 %v874_v47, %v872_v46  ;;  %v894_v42 = vld [vmem:[#allocation4 + $0x1b8] sm:$0xff]  ;;  %v1560_v44 = vpack.c.bf16 %v889_v39, %v887_v38  ;;  %v891_v46 = vld [vmem:[#allocation4 + $0x1a0] sm:$0xff]  ;;  %v893_v47 = vld [vmem:[#allocation4 + $0x1b0] sm:$0xff]  ;;  %v532_v38 = vlaneseq }
 0x225   :  { %1453 = vmatpush1.bf16.msra.mxu1 %v1452_v51  ;;  %v466_v51 = vld [vmem:[#allocation2 + $0x2f0] sm:$0xff] }
 0x226   :  { %1455 = vmatprep.subr.bf16.mxu1 %v1454_v52  ;;  %1521 = vmatpush1.bf16.msra.mxu0 %v1520_v57  ;;  %v471_v52 = vld [vmem:[#allocation2 + $0x318] sm:$0xff]  ;;  %v871_v57 = vld [vmem:[#allocation4 + $0x100] sm:$0xff]  ;;  %v1476_v61 = vpack.c.bf16 %v466_v51, %v462_v50  ;;  %v2018_v39 = vshrl.u32 %v532_v38, 7 }
 0x227   :  { %1523 = vmatprep.subr.bf16.mxu0 %v1522_v59  ;;  %v876_v59 = vld [vmem:[#allocation4 + $0x128] sm:$0xff]  ;;  %v1478_v62 = vpack.c.bf16 %v475_v53, %v471_v52  ;;  %v1544_v2 = vpack.c.bf16 %v873_v58, %v871_v57  ;;  %v898_v50 = vld [vmem:[#allocation4 + $0x1d8] sm:$0xff]  ;;  %v895_v52 = vld [vmem:[#allocation4 + $0x1c0] sm:$0xff] }
 0x228   :  { %v1546_v3 = vpack.c.bf16 %v878_v60, %v876_v59  ;;  %v902_v57 = vld [vmem:[#allocation4 + $0x1f8] sm:$0xff]  ;;  %v899_v59 = vld [vmem:[#allocation4 + $0x1e0] sm:$0xff]  ;;  %v901_v60 = vld [vmem:[#allocation4 + $0x1f0] sm:$0xff] }
 0x229   :  { %1457 = vmatpush1.bf16.msra.mxu1 %v1456_v0  ;;  %v474_v0 = vld [vmem:[#allocation2 + $0x330] sm:$0xff]  ;;  %v938_v38 = vld [vmem:[#allocation4 + $0x318] sm:$0xff] }
 0x22a   :  { %1459 = vmatprep.subr.bf16.mxu1 %v1458_v1  ;;  %1525 = vmatpush1.bf16.msra.mxu0 %v1524_v4  ;;  %v479_v1 = vld [vmem:[#allocation2 + $0x358] sm:$0xff]  ;;  %v875_v4 = vld [vmem:[#allocation4 + $0x120] sm:$0xff]  ;;  %v1480_v8 = vpack.c.bf16 %v474_v0, %v470_v63 }
 0x22b   :  { %1527 = vmatprep.subr.bf16.mxu0 %v1526_v6  ;;  %v880_v6 = vld [vmem:[#allocation4 + $0x148] sm:$0xff]  ;;  %v1482_v9 = vpack.c.bf16 %v483_v55, %v479_v1  ;;  %v1548_v13 = vpack.c.bf16 %v877_v5, %v875_v4  ;;  %v1135_v0 = vld [vmem:[%s2081_s4 + $0x80] sm:$0xff]  ;;  %v1137_v4 = vld [vmem:[%s2081_s4 + $0x90] sm:$0xff] }
 0x22c   :  { %v1550_v15 = vpack.c.bf16 %v882_v7, %v880_v6  ;;  %v1136_v1 = vld [vmem:[%s2081_s4 + $0x88] sm:$0xff]  ;;  %v1138_v5 = vld [vmem:[%s2081_s4 + $0x98] sm:$0xff] }
 0x22d   :  { %1461 = vmatpush1.bf16.msra.mxu1 %v1460_v11  ;;  %v482_v11 = vld [vmem:[#allocation2 + $0x370] sm:$0xff]  ;;  %v1638_v55 = vpack.c.bf16 %v1136_v1, %v1135_v0  ;;  %v1642_v7 = vpack.c.bf16 %v1138_v5, %v1137_v4  ;;  %v912_v0 = vld [vmem:[#allocation4 + $0x248] sm:$0xff]  ;;  %v914_v1 = vld [vmem:[#allocation4 + $0x258] sm:$0xff] }
 0x22e   :  { %1463 = vmatprep.subr.bf16.mxu1 %v1462_v12  ;;  %1529 = vmatpush1.bf16.msra.mxu0 %v1528_v16  ;;  %v487_v12 = vld [vmem:[#allocation2 + $0x398] sm:$0xff]  ;;  %v879_v16 = vld [vmem:[#allocation4 + $0x140] sm:$0xff]  ;;  %v1484_v20 = vpack.c.bf16 %v482_v11, %v478_v10  ;;  %v1140_v11 = vld [vmem:[%s2081_s4 + $0xa8] sm:$0xff] }
 0x22f   :  { %1531 = vmatprep.subr.bf16.mxu0 %v1530_v18  ;;  %v884_v18 = vld [vmem:[#allocation4 + $0x168] sm:$0xff]  ;;  %v1486_v21 = vpack.c.bf16 %v491_v14, %v487_v12  ;;  %v1552_v25 = vpack.c.bf16 %v881_v17, %v879_v16  ;;  %v1139_v10 = vld [vmem:[%s2081_s4 + $0xa0] sm:$0xff]  ;;  %v1141_v16 = vld [vmem:[%s2081_s4 + $0xb0] sm:$0xff] }
 0x230   :  { %v1554_v27 = vpack.c.bf16 %v886_v19, %v884_v18  ;;  %v1123_v14 = vld [vmem:[%s2081_s4 + $0x20] sm:$0xff]  ;;  %v1142_v17 = vld [vmem:[%s2081_s4 + $0xb8] sm:$0xff]  ;;  %v913_v4 = vld [vmem:[#allocation4 + $0x250] sm:$0xff] }
 0x231   :  { %1465 = vmatpush1.bf16.msra.mxu1 %v1464_v23  ;;  %v490_v23 = vld [vmem:[#allocation2 + $0x3b0] sm:$0xff]  ;;  %v1650_v19 = vpack.c.bf16 %v1142_v17, %v1141_v16  ;;  %v916_v5 = vld [vmem:[#allocation4 + $0x268] sm:$0xff]  ;;  %v919_v17 = vld [vmem:[#allocation4 + $0x280] sm:$0xff] }
 0x232   :  { %1467 = vmatprep.subr.bf16.mxu1 %v1466_v24  ;;  %1533 = vmatpush1.bf16.msra.mxu0 %v1532_v28  ;;  %v495_v24 = vld [vmem:[#allocation2 + $0x3d8] sm:$0xff]  ;;  %v883_v28 = vld [vmem:[#allocation4 + $0x160] sm:$0xff]  ;;  %v1488_v32 = vpack.c.bf16 %v490_v23, %v486_v22  ;;  %v1144_v23 = vld [vmem:[%s2081_s4 + $0xc8] sm:$0xff] }
 0x233   :  { %1535 = vmatprep.subr.bf16.mxu0 %v1534_v30  ;;  %v888_v30 = vld [vmem:[#allocation4 + $0x188] sm:$0xff]  ;;  %v1490_v33 = vpack.c.bf16 %v499_v26, %v495_v24  ;;  %v1143_v22 = vld [vmem:[%s2081_s4 + $0xc0] sm:$0xff] }
 0x234   :  { %v1558_v37 = vpack.c.bf16 %v890_v31, %v888_v30  ;;  %v1127_v26 = vld [vmem:[%s2081_s4 + $0x40] sm:$0xff] }
 0x235   :  { %1469 = vmatpush1.bf16.msra.mxu1 %v1468_v35  ;;  %v498_v35 = vld [vmem:[#allocation2 + $0x3f0] sm:$0xff] }
 0x236   :  { %1471 = vmatprep.subr.bf16.mxu1 %v1470_v36  ;;  %1537 = vmatpush1.bf16.msra.mxu0 %v1536_v40  ;;  %v1556_v36 = vpack.c.bf16 %v885_v29, %v883_v28  ;;  %v892_v40 = vld [vmem:[#allocation4 + $0x1a8] sm:$0xff]  ;;  %v1145_v28 = vld [vmem:[%s2081_s4 + $0xd0] sm:$0xff]  ;;  %v1146_v29 = vld [vmem:[%s2081_s4 + $0xd8] sm:$0xff] }
 0x237   :  { %1539 = vmatprep.subr.bf16.mxu0 %v1538_v43  ;;  %v1492_v43 = vpack.c.bf16 %v498_v35, %v494_v34  ;;  %v1562_v45 = vpack.c.bf16 %v894_v42, %v892_v40  ;;  %v1658_v31 = vpack.c.bf16 %v1146_v29, %v1145_v28  ;;  %v1147_v34 = vld [vmem:[%s2081_s4 + $0xe0] sm:$0xff]  ;;  %v1148_v35 = vld [vmem:[%s2081_s4 + $0xe8] sm:$0xff]  ;;  %v2021_v40 = vsub.s32 2, %v2018_v39 }
 0x238   :  { %v2026_v42 = vld [vmem:[%s2078_s1 + $0x28] sm:$0xff]  ;;  %v927_v29 = vld [vmem:[#allocation4 + $0x2c0] sm:$0xff] }
 0x239   :  { %1473 = vmatpush1.bf16.msra.mxu1 %v1472_v48  ;;  %v1564_v48 = vpack.c.bf16 %v893_v47, %v891_v46  ;;  %v539_v47 = vrot.slane %v2026_v42, %v2021_v40 }
 0x23a   :  { %1475 = vmatprep.subr.bf16.mxu1 %v1474_v49  ;;  %1541 = vmatpush1.bf16.msra.mxu0 %v1540_v41  ;;  %v896_v49 = vld [vmem:[#allocation4 + $0x1c8] sm:$0xff]  ;;  %v897_v41 = vld [vmem:[#allocation4 + $0x1d0] sm:$0xff] }
 0x23b   :  { %1543 = vmatprep.subr.bf16.mxu0 %v1542_v56  ;;  %v1566_v51 = vpack.c.bf16 %v898_v50, %v896_v49  ;;  %v1568_v53 = vpack.c.bf16 %v897_v41, %v895_v52  ;;  %v900_v56 = vld [vmem:[#allocation4 + $0x1e8] sm:$0xff]  ;;  %v903_v41 = vld [vmem:[#allocation4 + $0x200] sm:$0xff] }
 0x23c   :  { %v1570_v58 = vpack.c.bf16 %v902_v57, %v900_v56  ;;  %v908_v57 = vld [vmem:[#allocation4 + $0x228] sm:$0xff] }
 0x23d   :  { %1477 = vmatpush1.bf16.msra.mxu1 %v1476_v61  ;;  %v1572_v61 = vpack.c.bf16 %v901_v60, %v899_v59 }
 0x23e   :  { %1479 = vmatprep.subr.bf16.mxu1 %v1478_v62  ;;  %1545 = vmatpush1.bf16.msra.mxu0 %v1544_v2  ;;  %v906_v62 = vld [vmem:[#allocation4 + $0x218] sm:$0xff]  ;;  %v1119_v2 = vld [vmem:[%s2081_s4] sm:$0xff] }
 0x23f   :  { %1547 = vmatprep.subr.bf16.mxu0 %v1546_v3  ;;  %v1120_v3 = vld [vmem:[%s2081_s4 + $0x8] sm:$0xff] }
 0x240   :  { %v1640_v6 = vpack.c.bf16 %v1120_v3, %v1119_v2  ;;  %v911_v3 = vld [vmem:[#allocation4 + $0x240] sm:$0xff] }
 0x241   :  { %1481 = vmatpush1.bf16.msra.mxu1 %v1480_v8  ;;  %v1121_v8 = vld [vmem:[%s2081_s4 + $0x10] sm:$0xff] }
 0x242   :  { %1483 = vmatprep.subr.bf16.mxu1 %v1482_v9  ;;  %1549 = vmatpush1.bf16.msra.mxu0 %v1548_v13  ;;  %v1122_v9 = vld [vmem:[%s2081_s4 + $0x18] sm:$0xff]  ;;  %v1646_v13 = vpack.c.bf16 %v1140_v11, %v1139_v10  ;;  %v915_v11 = vld [vmem:[#allocation4 + $0x260] sm:$0xff] }
 0x243   :  { %1551 = vmatprep.subr.bf16.mxu0 %v1550_v15  ;;  %v1644_v12 = vpack.c.bf16 %v1122_v9, %v1121_v8  ;;  %v1124_v15 = vld [vmem:[%s2081_s4 + $0x28] sm:$0xff]  ;;  %v1584_v9 = vpack.c.bf16 %v913_v4, %v911_v3 }
 0x244   :  { %v1648_v18 = vpack.c.bf16 %v1124_v15, %v1123_v14  ;;  %v922_v14 = vld [vmem:[#allocation4 + $0x298] sm:$0xff] }
 0x245   :  { %1485 = vmatpush1.bf16.msra.mxu1 %v1484_v20  ;;  %v1125_v20 = vld [vmem:[%s2081_s4 + $0x30] sm:$0xff] }
 0x246   :  { %1487 = vmatprep.subr.bf16.mxu1 %v1486_v21  ;;  %1553 = vmatpush1.bf16.msra.mxu0 %v1552_v25  ;;  %v1126_v21 = vld [vmem:[%s2081_s4 + $0x38] sm:$0xff]  ;;  %v1654_v25 = vpack.c.bf16 %v1144_v23, %v1143_v22  ;;  %v923_v23 = vld [vmem:[#allocation4 + $0x2a0] sm:$0xff] }
 0x247   :  { %1555 = vmatprep.subr.bf16.mxu0 %v1554_v27  ;;  %v1652_v24 = vpack.c.bf16 %v1126_v21, %v1125_v20  ;;  %v1128_v27 = vld [vmem:[%s2081_s4 + $0x48] sm:$0xff]  ;;  %v926_v20 = vld [vmem:[#allocation4 + $0x2b8] sm:$0xff] }
 0x248   :  { %v1656_v30 = vpack.c.bf16 %v1128_v27, %v1127_v26  ;;  %v930_v26 = vld [vmem:[#allocation4 + $0x2d8] sm:$0xff] }
 0x249   :  { %1489 = vmatpush1.bf16.msra.mxu1 %v1488_v32  ;;  %v1129_v32 = vld [vmem:[%s2081_s4 + $0x50] sm:$0xff] }
 0x24a   :  { %1491 = vmatprep.subr.bf16.mxu1 %v1490_v33  ;;  %1557 = vmatpush1.bf16.msra.mxu0 %v1556_v36  ;;  %v1130_v33 = vld [vmem:[%s2081_s4 + $0x58] sm:$0xff] }
 0x24b   :  { %1559 = vmatprep.subr.bf16.mxu0 %v1558_v37  ;;  %v1660_v36 = vpack.c.bf16 %v1130_v33, %v1129_v32  ;;  %v1662_v37 = vpack.c.bf16 %v1148_v35, %v1147_v34  ;;  %v934_v32 = vld [vmem:[#allocation4 + $0x2f8] sm:$0xff]  ;;  %v931_v35 = vld [vmem:[#allocation4 + $0x2e0] sm:$0xff] }
 0x24d   :  { %1493 = vmatpush1.bf16.msra.mxu1 %v1492_v43 }
 0x24e   :  { %1561 = vmatpush1.bf16.msra.mxu0 %v1560_v44  ;;  %1639 = vmatprep.subr.bf16.mxu1 %v1638_v55  ;;  %v1582_v55 = vpack.c.bf16 %v914_v1, %v912_v0  ;;  %v947_v0 = vld [vmem:[#allocation4 + $0x360] sm:$0xff]  ;;  %v949_v1 = vld [vmem:[#allocation4 + $0x370] sm:$0xff] }
 0x24f   :  { %1563 = vmatprep.subr.bf16.mxu0 %v1562_v45  ;;  %v2031_v45 = vld [vmem:[%s2078_s1 + $0x20] sm:$0xff]  ;;  %v1620_v3 = vpack.c.bf16 %v949_v1, %v947_v0 }
 0x250   :  { %758 = vmatmul.mubr.f32.vlgmr.msra.gmra.mrb[4].mxu1 %v1934_v54  ;;  %v904_v54 = vld [vmem:[#allocation4 + $0x208] sm:$0xff]  ;;  %v535_v46 = vrot.slane %v2031_v45, %v2021_v40 }
 0x251   :  { %v1574_v63 = vpack.c.bf16 %v906_v62, %v904_v54  ;;  %1641 = vmatpush3.bf16.msra.mxu1 %v1640_v6  ;;  %v907_v62 = vld [vmem:[#allocation4 + $0x220] sm:$0xff]  ;;  %v918_v6 = vld [vmem:[#allocation4 + $0x278] sm:$0xff] }
 0x252   :  { %1565 = vmatpush1.bf16.msra.mxu0 %v1564_v48  ;;  %1643 = vmatprep.subr.bf16.mxu1 %v1642_v7  ;;  %v1586_v10 = vpack.c.bf16 %v918_v6, %v916_v5  ;;  %v951_v5 = vld [vmem:[#allocation4 + $0x380] sm:$0xff]  ;;  %v953_v6 = vld [vmem:[#allocation4 + $0x390] sm:$0xff] }
 0x253   :  { %1567 = vmatprep.subr.bf16.mxu0 %v1566_v51 }
 0x255   :  { %1645 = vmatpush3.bf16.msra.mxu1 %v1644_v12  ;;  %v917_v12 = vld [vmem:[#allocation4 + $0x270] sm:$0xff] }
 0x256   :  { %1569 = vmatpush1.bf16.msra.mxu0 %v1568_v53  ;;  %1647 = vmatprep.subr.bf16.mxu1 %v1646_v13  ;;  %v905_v53 = vld [vmem:[#allocation4 + $0x210] sm:$0xff]  ;;  %v920_v13 = vld [vmem:[#allocation4 + $0x288] sm:$0xff]  ;;  %v1588_v15 = vpack.c.bf16 %v917_v12, %v915_v11  ;;  %v1624_v11 = vpack.c.bf16 %v953_v6, %v951_v5 }
 0x257   :  { %1571 = vmatprep.subr.bf16.mxu0 %v1570_v58  ;;  %v910_v58 = vld [vmem:[#allocation4 + $0x238] sm:$0xff]  ;;  %v1576_v60 = vpack.c.bf16 %v905_v53, %v903_v41  ;;  %v1590_v16 = vpack.c.bf16 %v922_v14, %v920_v13  ;;  %v941_v41 = vld [vmem:[#allocation4 + $0x330] sm:$0xff]  ;;  %v944_v53 = vld [vmem:[#allocation4 + $0x348] sm:$0xff] }
 0x258   :  { %v1578_v54 = vpack.c.bf16 %v910_v58, %v908_v57  ;;  %v955_v13 = vld [vmem:[#allocation4 + $0x3a0] sm:$0xff]  ;;  %v957_v14 = vld [vmem:[#allocation4 + $0x3b0] sm:$0xff] }
 0x259   :  { %1649 = vmatpush3.bf16.msra.mxu1 %v1648_v18  ;;  %v921_v18 = vld [vmem:[#allocation4 + $0x290] sm:$0xff] }
 0x25a   :  { %1573 = vmatpush1.bf16.msra.mxu0 %v1572_v61  ;;  %1651 = vmatprep.subr.bf16.mxu1 %v1650_v19  ;;  %v924_v19 = vld [vmem:[#allocation4 + $0x2a8] sm:$0xff]  ;;  %v1592_v21 = vpack.c.bf16 %v921_v18, %v919_v17  ;;  %v1628_v17 = vpack.c.bf16 %v957_v14, %v955_v13  ;;  %v51_v18 = vld [vmem:[%s2078_s1 + $0x30] sm:$0xff] }
 0x25b   :  { %1575 = vmatprep.subr.bf16.mxu0 %v1574_v63  ;;  %v909_v63 = vld [vmem:[#allocation4 + $0x230] sm:$0xff]  ;;  %v1594_v22 = vpack.c.bf16 %v926_v20, %v924_v19  ;;  %v52_v19 = vld [vmem:[%s2078_s1 + $0x38] sm:$0xff] }
 0x25c   :  { %v1580_v2 = vpack.c.bf16 %v909_v63, %v907_v62 }
 0x25d   :  { %1653 = vmatpush3.bf16.msra.mxu1 %v1652_v24  ;;  %v925_v24 = vld [vmem:[#allocation4 + $0x2b0] sm:$0xff] }
 0x25e   :  { %1655 = vmatprep.subr.bf16.mxu1 %v1654_v25  ;;  %v928_v25 = vld [vmem:[#allocation4 + $0x2c8] sm:$0xff]  ;;  %v1596_v27 = vpack.c.bf16 %v925_v24, %v923_v23  ;;  %v966_v24 = vld [vmem:[#allocation4 + $0x3f8] sm:$0xff] }
 0x25f   :  { %v1598_v28 = vpack.c.bf16 %v930_v26, %v928_v25  ;;  %v964_v23 = vld [vmem:[#allocation4 + $0x3e8] sm:$0xff]  ;;  %v543_v25 = vrot.slane %v51_v18, %v2021_v40  ;;  %v547_v26 = vrot.slane %v52_v19, %v2021_v40  ;;  %v1131_v40 = vld [vmem:[%s2081_s4 + $0x60] sm:$0xff] }
 0x261   :  { %1657 = vmatpush3.bf16.msra.mxu1 %v1656_v30  ;;  %v929_v30 = vld [vmem:[#allocation4 + $0x2d0] sm:$0xff] }
 0x262   :  { %1659 = vmatprep.subr.bf16.mxu1 %v1658_v31  ;;  %v932_v31 = vld [vmem:[#allocation4 + $0x2e8] sm:$0xff]  ;;  %v1600_v33 = vpack.c.bf16 %v929_v30, %v927_v29  ;;  %v963_v29 = vld [vmem:[#allocation4 + $0x3e0] sm:$0xff]  ;;  %v965_v30 = vld [vmem:[#allocation4 + $0x3f0] sm:$0xff] }
 0x263   :  { %v1602_v34 = vpack.c.bf16 %v934_v32, %v932_v31 }
 0x265   :  { %1661 = vmatpush3.bf16.msra.mxu1 %v1660_v36  ;;  %v933_v36 = vld [vmem:[#allocation4 + $0x2f0] sm:$0xff] }
 0x266   :  { %1663 = vmatprep.subr.bf16.mxu1 %v1662_v37  ;;  %v936_v37 = vld [vmem:[#allocation4 + $0x308] sm:$0xff] }
 0x2df   :  { %v688_v43 = vpop.f32.mrb[2].mxu0 }
 0x2e0   :  { %v690_v44 = vpop.f32.mrb[3].mxu0 }
 0x2e3   :  { %v617_v48 = vpop.f32.mrb[2].mxu1 }
 0x2e4   :  { %v618_v49 = vadd.f32 %v617_v48, %v535_v46  ;;  %v619_v50 = vpop.f32.mrb[3].mxu1  ;;  %v935_v46 = vld [vmem:[#allocation4 + $0x300] sm:$0xff]  ;;  %v940_v48 = vld [vmem:[#allocation4 + $0x328] sm:$0xff] }
 0x2e5   :  { %v620_v51 = vadd.f32 %v619_v50, %v539_v47  ;;  %v937_v47 = vld [vmem:[#allocation4 + $0x310] sm:$0xff] }
 0x2e6   :  { %v689_v52 = vadd.f32 %v688_v43, %v618_v49  ;;  %v1604_v43 = vpack.c.bf16 %v933_v36, %v931_v35  ;;  %v942_v49 = vld [vmem:[#allocation4 + $0x338] sm:$0xff]  ;;  %v1608_v50 = vpack.c.bf16 %v937_v47, %v935_v46  ;;  %v1636_v35 = vpack.c.bf16 %v965_v30, %v963_v29 }
 0x2e7   :  { %v691_v56 = vadd.f32 %v690_v44, %v620_v51  ;;  %v1606_v44 = vpack.c.bf16 %v938_v38, %v936_v37  ;;  %v1610_v51 = vpack.c.bf16 %v942_v49, %v940_v48  ;;  %v1133_v48 = vld [vmem:[%s2081_s4 + $0x70] sm:$0xff]  ;;  %v1134_v49 = vld [vmem:[%s2081_s4 + $0x78] sm:$0xff] }
 0x2e8   :  { %v835_v61 = vmax.f32 %v689_v52, 0.0  ;;  %v939_v52 = vld [vmem:[#allocation4 + $0x320] sm:$0xff] }
 0x2e9   :  { %v836_v59 = vmax.f32 %v691_v56, 0.0  ;;  %v946_v56 = vld [vmem:[#allocation4 + $0x358] sm:$0xff]  ;;  %v1612_v57 = vpack.c.bf16 %v941_v41, %v939_v52 }
 0x2ea   :  { %v1614_v58 = vpack.c.bf16 %v946_v56, %v944_v53 }
 0x2eb   :  { %1039 = vmatprep.mubr.f32.mxu0 %v836_v59  ;;  %v943_v59 = vld [vmem:[#allocation4 + $0x340] sm:$0xff] }
 0x2ec   :  { %1040 = vmatmul.mubr.f32.vlgmr.msra.gmra.mrb[6].mxu0 %v835_v61  ;;  %v948_v61 = vld [vmem:[#allocation4 + $0x368] sm:$0xff] }
 0x2ed   :  { %1577 = vmatpush1.bf16.msra.mxu0 %v1576_v60  ;;  %v945_v60 = vld [vmem:[#allocation4 + $0x350] sm:$0xff] }
 0x2ee   :  { %1579 = vmatprep.subr.bf16.mxu0 %v1578_v54  ;;  %v950_v54 = vld [vmem:[#allocation4 + $0x378] sm:$0xff]  ;;  %v1616_v62 = vpack.c.bf16 %v945_v60, %v943_v59 }
 0x2ef   :  { %v1618_v63 = vpack.c.bf16 %v950_v54, %v948_v61  ;;  %v1153_v61 = vsub.s32 4, %v2018_v39 }
 0x2f0   :  { %v2037_v7 = vpop.f32.mrb[4].mxu0 }
 0x2f1   :  { %v2039_v8 = vpop.f32.mrb[5].mxu0  ;;  %1581 = vmatpush1.bf16.msra.mxu0 %v1580_v2  ;;  %v952_v2 = vld [vmem:[#allocation4 + $0x388] sm:$0xff] }
 0x2f2   :  { %1583 = vmatprep.subr.bf16.mxu0 %v1582_v55  ;;  %v954_v55 = vld [vmem:[#allocation4 + $0x398] sm:$0xff] }
 0x2f3   :  { %v1622_v4 = vpack.c.bf16 %v954_v55, %v952_v2 }
 0x2f5   :  { %1585 = vmatpush1.bf16.msra.mxu0 %v1584_v9  ;;  %v956_v9 = vld [vmem:[#allocation4 + $0x3a8] sm:$0xff] }
 0x2f6   :  { %1587 = vmatprep.subr.bf16.mxu0 %v1586_v10  ;;  %v958_v10 = vld [vmem:[#allocation4 + $0x3b8] sm:$0xff] }
 0x2f7   :  { %v1626_v12 = vpack.c.bf16 %v958_v10, %v956_v9 }
 0x2f9   :  { %1589 = vmatpush1.bf16.msra.mxu0 %v1588_v15  ;;  %v960_v15 = vld [vmem:[#allocation4 + $0x3c8] sm:$0xff] }
 0x2fa   :  { %1591 = vmatprep.subr.bf16.mxu0 %v1590_v16  ;;  %v962_v16 = vld [vmem:[#allocation4 + $0x3d8] sm:$0xff] }
 0x2fb   :  { %v1630_v20 = vpack.c.bf16 %v962_v16, %v960_v15 }
 0x2fd   :  { %1593 = vmatpush1.bf16.msra.mxu0 %v1592_v21  ;;  %v959_v21 = vld [vmem:[#allocation4 + $0x3c0] sm:$0xff] }
 0x2fe   :  { %1595 = vmatprep.subr.bf16.mxu0 %v1594_v22  ;;  %v961_v22 = vld [vmem:[#allocation4 + $0x3d0] sm:$0xff] }
 0x301   :  { %1597 = vmatpush1.bf16.msra.mxu0 %v1596_v27  ;;  %v1632_v27 = vpack.c.bf16 %v961_v22, %v959_v21 }
 0x302   :  { %1599 = vmatprep.subr.bf16.mxu0 %v1598_v28  ;;  %v1634_v28 = vpack.c.bf16 %v966_v24, %v964_v23 }
 0x305   :  { %1601 = vmatpush1.bf16.msra.mxu0 %v1600_v33 }
 0x306   :  { %1603 = vmatprep.subr.bf16.mxu0 %v1602_v34 }
 0x309   :  { %1605 = vmatpush1.bf16.msra.mxu0 %v1604_v43 }
 0x30a   :  { %1607 = vmatprep.subr.bf16.mxu0 %v1606_v44  ;;  %v1132_v44 = vld [vmem:[%s2081_s4 + $0x68] sm:$0xff] }
 0x30b   :  { %v1664_v46 = vpack.c.bf16 %v1132_v44, %v1131_v40 }
 0x30d   :  { %1609 = vmatpush1.bf16.msra.mxu0 %v1608_v50  ;;  %1665 = vmatpush3.bf16.msra.mxu1 %v1664_v46  ;;  %v1668_v50 = vpack.c.bf16 %v1134_v49, %v1133_v48 }
 0x30e   :  { %1611 = vmatprep.subr.bf16.mxu0 %v1610_v51  ;;  %v969_v51 = vsub.s32 3, %v2018_v39 }
 0x310   :  { %v970_v52 = vrot.slane %v2031_v45, %v969_v51  ;;  %v974_v41 = vrot.slane %v2026_v42, %v969_v51 }
 0x311   :  { %1613 = vmatpush1.bf16.msra.mxu0 %v1612_v57 }
 0x312   :  { %1615 = vmatprep.subr.bf16.mxu0 %v1614_v58 }
 0x315   :  { %1617 = vmatpush1.bf16.msra.mxu0 %v1616_v62  ;;  %v1154_v62 = vrot.slane %v2031_v45, %v1153_v61 }
 0x316   :  { %1619 = vmatprep.subr.bf16.mxu0 %v1618_v63 }
 0x319   :  { %1621 = vmatpush1.bf16.msra.mxu0 %v1620_v3 }
 0x31a   :  { %1623 = vmatprep.subr.bf16.mxu0 %v1622_v4 }
 0x31d   :  { %1625 = vmatpush1.bf16.msra.mxu0 %v1624_v11 }
 0x31e   :  { %1627 = vmatprep.subr.bf16.mxu0 %v1626_v12 }
 0x321   :  { %1629 = vmatpush1.bf16.msra.mxu0 %v1628_v17 }
 0x322   :  { %1631 = vmatprep.subr.bf16.mxu0 %v1630_v20 }
 0x323   :  { %v759_v31 = vpop.f32.mrb[4].mxu1 }
 0x324   :  { %v760_v32 = vadd.f32 %v759_v31, %v543_v25  ;;  %v761_v33 = vpop.f32.mrb[5].mxu1 }
 0x325   :  { %v762_v34 = vadd.f32 %v761_v33, %v547_v26  ;;  %1633 = vmatpush1.bf16.msra.mxu0 %v1632_v27 }
 0x326   :  { %v831_v36 = vadd.f32 %v2037_v7, %v760_v32  ;;  %1635 = vmatprep.subr.bf16.mxu0 %v1634_v28  ;;  %v1149_v7 = vld [vmem:[%s2081_s4 + $0xf0] sm:$0xff] }
 0x327   :  { %v833_v37 = vadd.f32 %v2039_v8, %v762_v34  ;;  %v1150_v8 = vld [vmem:[%s2081_s4 + $0xf8] sm:$0xff] }
 0x328   :  { %v837_v43 = vmax.f32 %v831_v36, 0.0  ;;  %v1666_v47 = vpack.c.bf16 %v1150_v8, %v1149_v7 }
 0x329   :  { %v838_v38 = vmax.f32 %v833_v37, 0.0  ;;  %1637 = vmatpush1.bf16.msra.mxu0 %v1636_v35 }
 0x32a   :  { %1667 = vmatprep.subr.bf16.mxu1 %v1666_v47 }
 0x32b   :  { %1110 = vmatprep.mubr.f32.mxu0 %v838_v38  ;;  %1669 = vmatpush3.bf16.msra.mxu1 %v1668_v50 }
 0x32c   :  { %1111 = vmatmul.mubr.f32.vlgmr.msra.gmra.mrb[6].mxu0 %v837_v43 }
 0x3ff   :  { %v1112_v53 = vpop.f32.mrb[6].mxu0 }
 0x400   :  { %v1678_v56 = vadd.f32 %v1112_v53, %v970_v52  ;;  %v1114_v57 = vpop.f32.mrb[7].mxu0 }
 0x401   :  { %v1679_v58 = vadd.f32 %v1114_v57, %v974_v41 }
 0x402   :  { %v1117_v60 = vmax.f32 %v1678_v56, 0.0 }
 0x403   :  { %v1118_v59 = vmax.f32 %v1679_v58, 0.0 }
 0x405   :  { %1219 = vmatprep.mubr.f32.mxu1 %v1118_v59 }
 0x406   :  { %1220 = vmatmul.mubr.f32.vlgmr.msra.gmra.mrb[6].mxu1 %v1117_v60 }
 0x4d9   :  { %v1289_v54 = vpop.f32.mrb[6].mxu1 }
 0x4da   :  { %v1290_v63 = vpop.f32.mrb[7].mxu1 }
 0x4db   :  { %v1291_v0 = vadd.f32 %v1290_v63, %v1289_v54 }
 0x4dd   :  { %v1222_v1 = vadd.f32 %v1291_v0, %v1154_v62 }
 0x4df   :  { %1226 = vst.msk [vmem:[%s2082_s5] sm:$0x3] %vm1225_vm8, %v1222_v1 }
 0x4e0   :  { %1231 = vsyncpa [#allocation3], 1 }
 0x4e1   :  { %1232 = vsyncpa [#allocation5], 1 }

</bundles_post_ra>
